<compile_context>
chip_gen: v6e
topology: v6e:2x2x1
jax: 0.10.0
libtpu: 0.0.40
codegen_flags: <defaults>
</compile_context>

<pallas_src>
import functools

import jax
import jax.numpy as jnp
from jax.experimental import pallas as pl
from jax.experimental.pallas import tpu as pltpu


def _round_up(x, m):
    return ((x + m - 1) // m) * m


def _vmem_limit_bytes():
    # Generation-aware VMEM budget with headroom (v7x: 64 MiB/TC -> ~48 MiB;
    # v5e/v6e: 128 MiB -> 96 MiB). Falls back to a conservative 64 MiB.
    try:
        cap = pltpu.get_tpu_info().vmem_capacity_bytes
    except Exception:
        return 64 * 1024 * 1024
    return max(32 * 1024 * 1024, int(cap) * 3 // 4)


def _const_spec(block_shape):
    # Constant-index operand (weights / biases / affine / resident txt block):
    # it never changes across the grid, so single-buffer it to halve its VMEM
    # footprint (default double-buffering is pure waste here).
    index_map = lambda *_: (0,) * len(block_shape)
    try:
        return pl.BlockSpec(block_shape, index_map, pipeline_mode=pl.Buffered(1))
    except (TypeError, AttributeError):
        return pl.BlockSpec(block_shape, index_map)


def _batch_tile(M, tm):
    """Batch tile: <= tm, 8-aligned, >=2 grid steps when possible (so v7x's two
    TensorCores both get work under dimension_semantics=('parallel',)), and
    balanced so the ragged tail block is small. No wrapper-side padding."""
    tm_cap = max(8, min(tm, _round_up(pl.cdiv(M, 2), 8)))
    n_tiles = pl.cdiv(M, tm_cap)
    return _round_up(pl.cdiv(M, n_tiles), 8)


# ----------------------------------------------------------------------------
# Fused Projection kernel: fc1 -> relu -> fc2 -> (+residual) -> layer_norm
#                          -> (emb, l2-normalized emb)
# ----------------------------------------------------------------------------
def _projection_kernel(x_ref, w1_ref, b1_ref, w2_ref, b2_ref,
                       gamma_ref, beta_ref, emb_ref, nrm_ref, *, eps):
    # fc1 on the MXU in the operands' native dtype (bf16 fast path on v6e/v7x),
    # accumulating in f32.
    projected = jnp.dot(x_ref[...], w1_ref[...],
                        preferred_element_type=jnp.float32) + b1_ref[...]

    # ReLU (f32 epilogue on the VPU).
    h = jnp.maximum(projected, 0.0)

    # fc2: cast the activation to the weight dtype for the MXU, accumulate f32.
    y = jnp.dot(h.astype(w2_ref.dtype), w2_ref[...],
                preferred_element_type=jnp.float32) + b2_ref[...]

    # Dropout(0.5) is identity at inference time.
    # TODO(synk): training-mode dropout (stateful PRNG mask) not implemented.

    # Residual add uses the pre-ReLU fc1 output, matching the PyTorch module.
    y = y + projected

    # LayerNorm over the last dim, biased variance via E[y^2] - mean^2 so the
    # two XLU reductions are independent (overlap with each other / the MXU).
    mean = jnp.mean(y, axis=-1, keepdims=True)
    mean_sq = jnp.mean(y * y, axis=-1, keepdims=True)
    var = jnp.maximum(mean_sq - mean * mean, 0.0)
    out = (y - mean) * jax.lax.rsqrt(var + eps) * gamma_ref[...] + beta_ref[...]
    emb_ref[...] = out.astype(emb_ref.dtype)

    # Fused L2 normalization: the logits head receives ready-to-matmul rows.
    inv_norm = jax.lax.rsqrt(jnp.sum(out * out, axis=-1, keepdims=True))
    nrm_ref[...] = (out * inv_norm).astype(nrm_ref.dtype)


def projection_forward(x, w1, b1, w2, b2, gamma, beta, *, eps=1e-5, tm=512,
                       matmul_dtype=None):
    """Fused Projection.forward + L2 normalization.

    x: (M, D); w1: (D, H); b1: (H,); w2: (H, O); b2: (O,); gamma/beta: (O,).
    Returns (emb, emb_norm), both (M, O).
    """
    M, D = x.shape
    H = w1.shape[1]
    O = w2.shape[1]
    assert H == O, "residual add requires hidden_dim == output_dim"

    if matmul_dtype is not None:
        # bf16 MXU fast path (preferred on v6e/v7x): cast activations/weights
        # ONCE here; the kernel keeps f32 accumulation and an f32 epilogue.
        x = x.astype(matmul_dtype)
        w1 = w1.astype(matmul_dtype)
        w2 = w2.astype(matmul_dtype)

    tm_eff = _batch_tile(M, tm)
    grid = (pl.cdiv(M, tm_eff),)  # ragged last block: Pallas masks OOB rows;
                                  # safe because every row is independent.

    # Biases / affine params as (1, F) f32 rows -> single broadcastable vregs.
    b1_2d = b1.reshape(1, H).astype(jnp.float32)
    b2_2d = b2.reshape(1, O).astype(jnp.float32)
    gamma_2d = gamma.reshape(1, O).astype(jnp.float32)
    beta_2d = beta.reshape(1, O).astype(jnp.float32)

    kernel = functools.partial(_projection_kernel, eps=eps)

    flops = 2 * M * (D * H + H * O)
    bytes_accessed = (
        M * D * x.dtype.itemsize            # x
        + D * H * w1.dtype.itemsize         # w1
        + H * O * w2.dtype.itemsize         # w2
        + 4 * O * 4                         # b1, b2, gamma, beta (f32)
        + 2 * M * O * x.dtype.itemsize      # emb + emb_norm
    )

    emb, emb_n = pl.pallas_call(
        kernel,
        out_shape=(jax.ShapeDtypeStruct((M, O), x.dtype),
                   jax.ShapeDtypeStruct((M, O), x.dtype)),
        grid_spec=pltpu.PrefetchScalarGridSpec(
            num_scalar_prefetch=0,
            grid=grid,
            in_specs=[
                pl.BlockSpec((tm_eff, D), lambda i: (i, 0)),   # x tile (pipelined)
                _const_spec((D, H)),                           # W1 (resident, 1-buf)
                _const_spec((1, H)),                           # b1
                _const_spec((H, O)),                           # W2 (resident, 1-buf)
                _const_spec((1, O)),                           # b2
                _const_spec((1, O)),                           # gamma
                _const_spec((1, O)),                           # beta
            ],
            out_specs=[pl.BlockSpec((tm_eff, O), lambda i: (i, 0)),
                       pl.BlockSpec((tm_eff, O), lambda i: (i, 0))],
        ),
        compiler_params=pltpu.CompilerParams(
            dimension_semantics=("parallel",),
            vmem_limit_bytes=_vmem_limit_bytes(),
        ),
        cost_estimate=pl.CostEstimate(
            flops=flops, transcendentals=2 * M, bytes_accessed=bytes_accessed),
    )(x, w1, b1_2d, w2, b2_2d, gamma_2d, beta_2d)

    # TODO(synk): if D/H/O grow beyond VMEM residency (esp. v7x 64 MiB), add a
    # K/N-tiled grid with an f32 accumulator instead of fully-resident weights.
    return emb, emb_n


# ----------------------------------------------------------------------------
# CLIP logits head: logits = img_n @ txt_n.T * exp(temperature)
# (embeddings arrive already L2-normalized from the projection kernel)
# ----------------------------------------------------------------------------
def _clip_logits_kernel(scale_ref, img_ref, txt_ref, logits_ref):
    scale = scale_ref[0]  # exp(temperature), hoisted to the wrapper, SMEM scalar
    logits = jax.lax.dot_general(
        img_ref[...], txt_ref[...], (((1,), (1,)), ((), ())),
        preferred_element_type=jnp.float32)
    logits_ref[...] = logits * scale


def clip_logits(img_norm, txt_norm, log_temperature, *, tmi=256):
    """img_norm: (Mi, O); txt_norm: (Mt, O); both already L2-normalized."""
    Mi, O = img_norm.shape
    Mt, _ = txt_norm.shape

    # Lane-dense output: pad the text batch to a multiple of 128 so logits
    # stores are unmasked vst's; zero rows give zero columns, sliced off below.
    Mt_pad = _round_up(Mt, 128)
    if Mt_pad != Mt:
        txt_norm = jnp.pad(txt_norm, ((0, Mt_pad - Mt), (0, 0)))

    # exp(temperature) computed once in the wrapper, passed as an SMEM scalar.
    scale = jnp.exp(jnp.asarray(log_temperature, jnp.float32)).reshape(1)

    tmi_eff = _batch_tile(Mi, tmi)
    grid = (pl.cdiv(Mi, tmi_eff),)

    logits = pl.pallas_call(
        _clip_logits_kernel,
        out_shape=jax.ShapeDtypeStruct((Mi, Mt_pad), jnp.float32),
        grid_spec=pltpu.PrefetchScalarGridSpec(
            num_scalar_prefetch=0,
            grid=grid,
            in_specs=[
                pl.BlockSpec(memory_space=pltpu.MemorySpace.SMEM),  # scale (1,)
                pl.BlockSpec((tmi_eff, O), lambda i: (i, 0)),       # img tile
                _const_spec((Mt_pad, O)),                           # txt (resident)
            ],
            out_specs=pl.BlockSpec((tmi_eff, Mt_pad), lambda i: (i, 0)),
        ),
        compiler_params=pltpu.CompilerParams(
            dimension_semantics=("parallel",),
            vmem_limit_bytes=_vmem_limit_bytes(),
        ),
        cost_estimate=pl.CostEstimate(
            flops=2 * Mi * Mt_pad * O, transcendentals=0,
            bytes_accessed=(Mi * O + Mt_pad * O) * img_norm.dtype.itemsize
            + Mi * Mt_pad * 4),
    )(scale, img_norm, txt_norm)
    return logits[:, :Mt] if Mt_pad != Mt else logits


# ----------------------------------------------------------------------------
# Full CLIP head (matches CLIP.forward after the encoders)
# ----------------------------------------------------------------------------
def clip_forward(img_features, txt_features, w1, b1, w2, b2, gamma, beta,
                 log_temperature, *, eps=1e-5, tm=512, matmul_dtype=None):
    """Returns (img_emb, txt_emb, logits) like the PyTorch module."""
    Mi = img_features.shape[0]
    txt_features = txt_features.astype(img_features.dtype)
    # One pallas_call for both batches: they share W1/W2/LayerNorm, so the
    # concatenation halves resident-weight HBM traffic and launch overhead.
    feats = jnp.concatenate([img_features, txt_features], axis=0)
    emb, emb_n = projection_forward(feats, w1, b1, w2, b2, gamma, beta,
                                    eps=eps, tm=tm, matmul_dtype=matmul_dtype)
    img_emb, txt_emb = emb[:Mi], emb[Mi:]
    img_n, txt_n = emb_n[:Mi], emb_n[Mi:]
    logits = clip_logits(img_n, txt_n, log_temperature)
    return img_emb, txt_emb, logits


# ----------------------------------------------------------------------------
# Pure-JAX references
# ----------------------------------------------------------------------------
def _projection_reference(x, w1, b1, w2, b2, gamma, beta, eps=1e-5):
    x = x.astype(jnp.float32)
    projected = x @ w1.astype(jnp.float32) + b1
    h = jnp.maximum(projected, 0.0)
    y = h @ w2.astype(jnp.float32) + b2
    y = y + projected
    mean = jnp.mean(y, axis=-1, keepdims=True)
    var = jnp.mean((y - mean) ** 2, axis=-1, keepdims=True)
    return ((y - mean) * jax.lax.rsqrt(var + eps)) * gamma + beta


def _clip_reference(img_features, txt_features, w1, b1, w2, b2, gamma, beta,
                    log_temperature):
    img_emb = _projection_reference(img_features, w1, b1, w2, b2, gamma, beta)
    txt_emb = _projection_reference(txt_features, w1, b1, w2, b2, gamma, beta)
    img_n = img_emb / jnp.linalg.norm(img_emb, axis=1, keepdims=True)
    txt_n = txt_emb / jnp.linalg.norm(txt_emb, axis=1, keepdims=True)
    return img_emb, txt_emb, (img_n @ txt_n.T) * jnp.exp(log_temperature)


if __name__ == "__main__":
    # Feature dims are multiples of 256 (full MXU tile on v6e/v7x, lane-dense
    # everywhere); batches are ragged so the padding-free grid path is tested.
    input_dim, hidden_dim, output_dim = 256, 256, 256
    batch_img, batch_txt = 80, 56

    key = jax.random.PRNGKey(0)
    k_img, k_txt, k1, kb1, k2, kb2 = jax.random.split(key, 6)

    img_features = jax.random.normal(k_img, (batch_img, input_dim), jnp.float32)
    txt_features = jax.random.normal(k_txt, (batch_txt, input_dim), jnp.float32)

    # Deterministic init mimicking PyTorch Linear (uniform +/- 1/sqrt(fan_in)).
    bound1 = 1.0 / (input_dim ** 0.5)
    w1 = jax.random.uniform(k1, (input_dim, hidden_dim), jnp.float32, -bound1, bound1)
    b1 = jax.random.uniform(kb1, (hidden_dim,), jnp.float32, -bound1, bound1)
    bound2 = 1.0 / (hidden_dim ** 0.5)
    w2 = jax.random.uniform(k2, (hidden_dim, output_dim), jnp.float32, -bound2, bound2)
    b2 = jax.random.uniform(kb2, (output_dim,), jnp.float32, -bound2, bound2)
    gamma = jnp.ones((output_dim,), jnp.float32)   # LayerNorm weight init
    beta = jnp.zeros((output_dim,), jnp.float32)   # LayerNorm bias init

    log_temperature = jnp.float32(jnp.log(1.0 / 0.07))

    img_ref, txt_ref, logits_ref = _clip_reference(
        img_features, txt_features, w1, b1, w2, b2, gamma, beta, log_temperature)

    # --- f32 path ------------------------------------------------------------
    img_emb, txt_emb, logits = clip_forward(
        img_features, txt_features, w1, b1, w2, b2, gamma, beta, log_temperature)
    jax.block_until_ready((img_emb, txt_emb, logits))

    assert img_emb.shape == (batch_img, output_dim)
    assert txt_emb.shape == (batch_txt, output_dim)
    assert logits.shape == (batch_img, batch_txt)
    assert jnp.allclose(img_emb, img_ref, atol=1e-4, rtol=1e-4), "img_emb mismatch"
    assert jnp.allclose(txt_emb, txt_ref, atol=1e-4, rtol=1e-4), "txt_emb mismatch"
    assert jnp.allclose(logits, logits_ref, atol=5e-3, rtol=1e-3), "logits mismatch"

    # --- multi-tile path: small tm forces several grid steps + ragged tail ----
    img_emb_t, txt_emb_t, logits_t = clip_forward(
        img_features, txt_features, w1, b1, w2, b2, gamma, beta, log_temperature,
        tm=32)
    jax.block_until_ready(logits_t)
    assert jnp.allclose(img_emb_t, img_ref, atol=1e-4, rtol=1e-4), "tiled emb mismatch"
    assert jnp.allclose(txt_emb_t, txt_ref, atol=1e-4, rtol=1e-4), "tiled emb mismatch"
    assert jnp.allclose(logits_t, logits_ref, atol=5e-3, rtol=1e-3), "tiled logits mismatch"

    # --- bf16 MXU fast path (preferred on v6e/v7x), f32 accumulation/epilogue -
    img_emb_bf, txt_emb_bf, logits_bf = clip_forward(
        img_features, txt_features, w1, b1, w2, b2, gamma, beta, log_temperature,
        matmul_dtype=jnp.bfloat16)
    jax.block_until_ready(logits_bf)
    assert jnp.allclose(img_emb_bf.astype(jnp.float32), img_ref,
                        atol=1e-1, rtol=1e-1), "bf16 emb mismatch"
    assert jnp.allclose(logits_bf, logits_ref, atol=5e-1, rtol=1e-1), \
        "bf16 logits mismatch"

    print("KERNEL_OK")
</pallas_src>

<mosaic_0001>
module attributes {stable_mosaic.version = 11 : i64} {
  func.func @_projection_kernel(%arg0: i32, %arg1: memref<72x256xf32, #tpu.memory_space<vmem>>, %arg2: memref<256x256xf32, #tpu.memory_space<vmem>>, %arg3: memref<1x256xf32, #tpu.memory_space<vmem>>, %arg4: memref<256x256xf32, #tpu.memory_space<vmem>>, %arg5: memref<1x256xf32, #tpu.memory_space<vmem>>, %arg6: memref<1x256xf32, #tpu.memory_space<vmem>>, %arg7: memref<1x256xf32, #tpu.memory_space<vmem>>, %arg8: memref<72x256xf32, #tpu.memory_space<vmem>>, %arg9: memref<72x256xf32, #tpu.memory_space<vmem>>) attributes {dimension_semantics = [#tpu.dimension_semantics<parallel>], iteration_bounds = array<i64: 2>, scalar_prefetch = 0 : i64, scratch_operands = 0 : i64, tpu.core_type = #tpu.core_type<tc>, window_params = [{transform_indices = @transform_0, window_bounds = array<i64: 72, 256>}, {pipeline_mode = #tpu.pipeline_mode<synchronous>, transform_indices = @transform_1, window_bounds = array<i64: 256, 256>}, {pipeline_mode = #tpu.pipeline_mode<synchronous>, transform_indices = @transform_2, window_bounds = array<i64: 1, 256>}, {pipeline_mode = #tpu.pipeline_mode<synchronous>, transform_indices = @transform_3, window_bounds = array<i64: 256, 256>}, {pipeline_mode = #tpu.pipeline_mode<synchronous>, transform_indices = @transform_4, window_bounds = array<i64: 1, 256>}, {pipeline_mode = #tpu.pipeline_mode<synchronous>, transform_indices = @transform_5, window_bounds = array<i64: 1, 256>}, {pipeline_mode = #tpu.pipeline_mode<synchronous>, transform_indices = @transform_6, window_bounds = array<i64: 1, 256>}, {transform_indices = @transform_7, window_bounds = array<i64: 72, 256>}, {transform_indices = @transform_8, window_bounds = array<i64: 72, 256>}]} {
    %c0 = arith.constant 0 : index
    %c0_0 = arith.constant 0 : index
    %0 = vector.load %arg1[%c0, %c0_0] : memref<72x256xf32, #tpu.memory_space<vmem>>, vector<72x256xf32>
    %c0_1 = arith.constant 0 : index
    %c0_2 = arith.constant 0 : index
    %1 = vector.load %arg2[%c0_1, %c0_2] : memref<256x256xf32, #tpu.memory_space<vmem>>, vector<256x256xf32>
    %cst = arith.constant dense<0.000000e+00> : vector<72x256xf32>
    %2 = tpu.matmul %0, %1, %cst {dimension_numbers = #tpu.dot_dimension_numbers<[1], [0], [0], [1], [0, 0, 1, 1], [], []>} : vector<72x256xf32>, vector<256x256xf32>, vector<72x256xf32> -> vector<72x256xf32>
    %c0_3 = arith.constant 0 : index
    %c0_4 = arith.constant 0 : index
    %3 = vector.load %arg3[%c0_3, %c0_4] : memref<1x256xf32, #tpu.memory_space<vmem>>, vector<1x256xf32>
    %4 = vector.broadcast %3 : vector<1x256xf32> to vector<72x256xf32>
    %5 = arith.addf %2, %4 : vector<72x256xf32>
    %cst_5 = arith.constant 0.000000e+00 : f32
    %6 = vector.broadcast %cst_5 : f32 to vector<72x256xf32>
    %7 = arith.maximumf %5, %6 : vector<72x256xf32>
    %c0_6 = arith.constant 0 : index
    %c0_7 = arith.constant 0 : index
    %8 = vector.load %arg4[%c0_6, %c0_7] : memref<256x256xf32, #tpu.memory_space<vmem>>, vector<256x256xf32>
    %cst_8 = arith.constant dense<0.000000e+00> : vector<72x256xf32>
    %9 = tpu.matmul %7, %8, %cst_8 {dimension_numbers = #tpu.dot_dimension_numbers<[1], [0], [0], [1], [0, 0, 1, 1], [], []>} : vector<72x256xf32>, vector<256x256xf32>, vector<72x256xf32> -> vector<72x256xf32>
    %c0_9 = arith.constant 0 : index
    %c0_10 = arith.constant 0 : index
    %10 = vector.load %arg5[%c0_9, %c0_10] : memref<1x256xf32, #tpu.memory_space<vmem>>, vector<1x256xf32>
    %11 = vector.broadcast %10 : vector<1x256xf32> to vector<72x256xf32>
    %12 = arith.addf %9, %11 : vector<72x256xf32>
    %13 = arith.addf %12, %5 : vector<72x256xf32>
    %cst_11 = arith.constant dense<0.000000e+00> : vector<72xf32>
    %14 = vector.multi_reduction <add>, %13, %cst_11 [1] : vector<72x256xf32> to vector<72xf32>
    %15 = vector.shape_cast %14 : vector<72xf32> to vector<72x1xf32>
    %cst_12 = arith.constant 2.560000e+02 : f32
    %16 = vector.broadcast %cst_12 : f32 to vector<72x1xf32>
    %17 = arith.divf %15, %16 : vector<72x1xf32>
    %18 = arith.mulf %13, %13 : vector<72x256xf32>
    %cst_13 = arith.constant dense<0.000000e+00> : vector<72xf32>
    %19 = vector.multi_reduction <add>, %18, %cst_13 [1] : vector<72x256xf32> to vector<72xf32>
    %20 = vector.shape_cast %19 : vector<72xf32> to vector<72x1xf32>
    %cst_14 = arith.constant 2.560000e+02 : f32
    %21 = vector.broadcast %cst_14 : f32 to vector<72x1xf32>
    %22 = arith.divf %20, %21 : vector<72x1xf32>
    %23 = arith.mulf %17, %17 : vector<72x1xf32>
    %24 = arith.subf %22, %23 : vector<72x1xf32>
    %cst_15 = arith.constant 0.000000e+00 : f32
    %25 = vector.broadcast %cst_15 : f32 to vector<72x1xf32>
    %26 = arith.maximumf %24, %25 : vector<72x1xf32>
    %27 = vector.broadcast %17 : vector<72x1xf32> to vector<72x256xf32>
    %28 = arith.subf %13, %27 : vector<72x256xf32>
    %cst_16 = arith.constant 9.99999974E-6 : f32
    %29 = vector.broadcast %cst_16 : f32 to vector<72x1xf32>
    %30 = arith.addf %26, %29 : vector<72x1xf32>
    %31 = math.rsqrt %30 : vector<72x1xf32>
    %32 = vector.broadcast %31 : vector<72x1xf32> to vector<72x256xf32>
    %33 = arith.mulf %28, %32 : vector<72x256xf32>
    %c0_17 = arith.constant 0 : index
    %c0_18 = arith.constant 0 : index
    %34 = vector.load %arg6[%c0_17, %c0_18] : memref<1x256xf32, #tpu.memory_space<vmem>>, vector<1x256xf32>
    %35 = vector.broadcast %34 : vector<1x256xf32> to vector<72x256xf32>
    %36 = arith.mulf %33, %35 : vector<72x256xf32>
    %c0_19 = arith.constant 0 : index
    %c0_20 = arith.constant 0 : index
    %37 = vector.load %arg7[%c0_19, %c0_20] : memref<1x256xf32, #tpu.memory_space<vmem>>, vector<1x256xf32>
    %38 = vector.broadcast %37 : vector<1x256xf32> to vector<72x256xf32>
    %39 = arith.addf %36, %38 : vector<72x256xf32>
    %c0_21 = arith.constant 0 : index
    %c0_22 = arith.constant 0 : index
    %40 = vector.load %arg8[%c0_21, %c0_22] : memref<72x256xf32, #tpu.memory_space<vmem>>, vector<72x256xf32>
    tpu.vector_store %arg8[%c0_21, %c0_22], %39 {strides = array<i32>} : memref<72x256xf32, #tpu.memory_space<vmem>>, vector<72x256xf32>,
    %41 = arith.mulf %39, %39 : vector<72x256xf32>
    %cst_23 = arith.constant dense<0.000000e+00> : vector<72xf32>
    %42 = vector.multi_reduction <add>, %41, %cst_23 [1] : vector<72x256xf32> to vector<72xf32>
    %43 = vector.shape_cast %42 : vector<72xf32> to vector<72x1xf32>
    %44 = math.rsqrt %43 : vector<72x1xf32>
    %45 = vector.broadcast %44 : vector<72x1xf32> to vector<72x256xf32>
    %46 = arith.mulf %39, %45 : vector<72x256xf32>
    %c0_24 = arith.constant 0 : index
    %c0_25 = arith.constant 0 : index
    %47 = vector.load %arg9[%c0_24, %c0_25] : memref<72x256xf32, #tpu.memory_space<vmem>>, vector<72x256xf32>
    tpu.vector_store %arg9[%c0_24, %c0_25], %46 {strides = array<i32>} : memref<72x256xf32, #tpu.memory_space<vmem>>, vector<72x256xf32>,
    return
  }
  func.func @transform_0(%arg0: i32) -> (i32, i32) {
    %c0_i32 = arith.constant 0 : i32
    %c0_i32_0 = arith.constant 0 : i32
    return %arg0, %c0_i32 : i32, i32
  }
  func.func @transform_1(%arg0: i32) -> (i32, i32) {
    %c0_i32 = arith.constant 0 : i32
    %c0_i32_0 = arith.constant 0 : i32
    %c0_i32_1 = arith.constant 0 : i32
    return %c0_i32, %c0_i32_0 : i32, i32
  }
  func.func @transform_2(%arg0: i32) -> (i32, i32) {
    %c0_i32 = arith.constant 0 : i32
    %c0_i32_0 = arith.constant 0 : i32
    %c0_i32_1 = arith.constant 0 : i32
    return %c0_i32, %c0_i32_0 : i32, i32
  }
  func.func @transform_3(%arg0: i32) -> (i32, i32) {
    %c0_i32 = arith.constant 0 : i32
    %c0_i32_0 = arith.constant 0 : i32
    %c0_i32_1 = arith.constant 0 : i32
    return %c0_i32, %c0_i32_0 : i32, i32
  }
  func.func @transform_4(%arg0: i32) -> (i32, i32) {
    %c0_i32 = arith.constant 0 : i32
    %c0_i32_0 = arith.constant 0 : i32
    %c0_i32_1 = arith.constant 0 : i32
    return %c0_i32, %c0_i32_0 : i32, i32
  }
  func.func @transform_5(%arg0: i32) -> (i32, i32) {
    %c0_i32 = arith.constant 0 : i32
    %c0_i32_0 = arith.constant 0 : i32
    %c0_i32_1 = arith.constant 0 : i32
    return %c0_i32, %c0_i32_0 : i32, i32
  }
  func.func @transform_6(%arg0: i32) -> (i32, i32) {
    %c0_i32 = arith.constant 0 : i32
    %c0_i32_0 = arith.constant 0 : i32
    %c0_i32_1 = arith.constant 0 : i32
    return %c0_i32, %c0_i32_0 : i32, i32
  }
  func.func @transform_7(%arg0: i32) -> (i32, i32) {
    %c0_i32 = arith.constant 0 : i32
    %c0_i32_0 = arith.constant 0 : i32
    return %arg0, %c0_i32 : i32, i32
  }
  func.func @transform_8(%arg0: i32) -> (i32, i32) {
    %c0_i32 = arith.constant 0 : i32
    %c0_i32_0 = arith.constant 0 : i32
    return %arg0, %c0_i32 : i32, i32
  }
}

</mosaic_0001>

<bundles_post_ra>
// kernel: tpu_custom_call.1
= control target key start
LH: loop header
LB: loop body
LE: loop exit
PB: predicated region body
PF: predicated region fallthrough
CT: control target
= control target key end

     0   :  { %s2508_s0 = inlined_call_operand.hbm [shape: f32[136,256], index: 0, kind: input, shape index: {}]   ;;  %s2509_s1 = inlined_call_operand.hbm [shape: f32[256,256], index: 1, kind: input, shape index: {}]   ;;  %s2510_s2 = inlined_call_operand.vmem [shape: f32[1,256], index: 2, kind: input, shape index: {}]   ;;  %s2511_s3 = inlined_call_operand.hbm [shape: f32[256,256], index: 3, kind: input, shape index: {}]   ;;  %s2512_s4 = inlined_call_operand.vmem [shape: f32[1,256], index: 4, kind: input, shape index: {}]   ;;  %s2513_s5 = inlined_call_operand.vmem [shape: f32[1,256], index: 5, kind: input, shape index: {}]   ;;  %s2514_s6 = inlined_call_operand.vmem [shape: f32[1,256], index: 6, kind: input, shape index: {}]   ;;  %s2515_s7 = inlined_call_operand.hbm [shape: f32[136,256], index: 7, kind: output, shape index: {0}]   ;;  %s2516_s8 = inlined_call_operand.hbm [shape: f32[136,256], index: 8, kind: output, shape index: {1}]  }
   0x1   :  { %2519 = sst [smem:[#allocation15_spill]] %s2509_s1 }
   0x2   :  { %2520 = sst [smem:[#allocation16_spill]] %s2511_s3 }
   0x3   :  { %14 = vsyncpa [#allocation3], 0 }
   0x4   :  { %16 = vsyncpa [#allocation3 + $0x1], 0 }
   0x5   :  { %17 = vsyncpa [#allocation6], 0 }
   0x6   :  { %18 = vsyncpa [#allocation4], 0 }
   0x7   :  { %20 = vsyncpa [#allocation4 + $0x1], 0 }
   0x8   :  { %21 = vsyncpa [#allocation10], 0 }
   0x9   :  { %23 = vsyncpa [#allocation10 + $0x1], 0  ;;  %s1738_s27 = smov 0   ;;  %s1740_s28 = smov 0  }
   0xa   :  { %s1742_s29 = smov 0   ;;  %s1744_s30 = smov 0  }
   0xb LB: > { %s1759_s9 = sadd.s32 4294967295, %s1678_s30   ;;  %s1349_s10 = sadd.s32 4294967294, %s1678_s30   ;;  %s1678_s30 = sphi %s1744_s30, %s2538_s30   ;;  %s1674_s29 = sphi %s1742_s29, %s2537_s29   ;;  %s1670_s28 = sphi %s1740_s28, %s2536_s28   ;;  %s1666_s27 = sphi %s1738_s27, %s2535_s27  }
   0xc   : > { %s1763_s11 = sadd.s32 1, %s1678_s30   ;;  %s36_s12 = sadd.s32 1, %s1674_s29 }
   0xd   : > { %s33_s13 = ssub.s32 %s1678_s30, %s1763_s11  ;;  %p43_p0 = scmp.ne.s32.totalorder %s1674_s29, %s1670_s28 }
   0xe   : > { %p34_p1 = scmp.eq.s32.totalorder %s33_s13, 0  ;;  %p44_p2 = scmp.eq.s32.totalorder %s1678_s30, 0 }
   0xf   : > { %p49_p3 = scmp.ne.s32.totalorder %s1670_s28, %s1666_s27  ;;  %p2517_p4 = scmp.eq.s32.totalorder %s1759_s9, 0 }
  0x10   : > { %s1775_s14 = scalar_select %p34_p1, %s1674_s29, %s36_s12  }
  0x11   : > { %p1777_p5 = por %p44_p2, %p43_p0  ;;  %p1783_p6 = por %p2517_p4, %p49_p3 }
  0x12   : > { %p199_p7 = scmp.eq.s32.totalorder %s1759_s9, 1  ;;  %p205_p8 = scmp.eq.s32.totalorder %s1349_s10, 1 }
  0x13   : > { %s2522_s16 = scalar_select %p1783_p6, 1, 0 }
  0x14   : > { %p1350_p9 = scmp.ge.s32.totalorder %s1678_s30, 1  ;;  %p238_p10 = scmp.lt.s32.totalorder %s1678_s30, 3 }
  0x15   : > { %p1790_p11 = por %p199_p7, %p43_p0  ;;  %p1794_p12 = por %p205_p8, %p49_p3 }
  0x16   : > { %p1798_p13 = pnand %p1350_p9, %p238_p10  ;;  %s1680_s20 = smov [#allocation5]  }
  0x17   : > { %s2523_s17 = scalar_select %p1790_p11, 1, 0 }
  0x18   : > { %s2524_s18 = scalar_select %p1794_p12, 1, 0 }
  0x19   : > { %p1405_p1 = pneg %p1798_p13  ;;  %s250_s21 = sshll.u32 %s1680_s20, 4  ;;  %s251_s21 = int_to_ptr.vmem [resolvable:$true] %s250_s21 }
  0x1a   : > { %s1681_s23 = smov [#allocation7]   ;;  %s1513_s25 = scalar_lea.vmem %s251_s21, 8192 }
  0x1b   : > { %p1806_p2 = pnand %p1405_p1, %p2517_p4  ;;  %s266_s24 = sshll.u32 %s1681_s23, 4  ;;  %s267_s24 = int_to_ptr.vmem [resolvable:$true] %s266_s24 }
  0x1c   : > { %p1514_p3 = scmp.ne.s32.totalorder %s251_s21, %s1513_s25  ;;  %p1521_p9 = scmp.lt.s32.totalorder %s251_s21, %s251_s21 }
  0x1d   : > { %p1504_p0 = pneg %p1806_p2  ;;  %p1522_p10 = scmp.lt.s32.totalorder %s1513_s25, %s1513_s25 }
  0x1f   : > { %p1516_p7 = pnand %p1514_p3, %p1504_p0  ;;  %p1523_p12 = por %p1522_p10, %p1521_p9 }
  0x21   : > { %p1517_p8 = pneg %p1516_p7 }
  0x23   : > { %p1524_p1 = pnand %p1523_p12, %p1517_p8 }
  0x25   : > { %1527 = shalt.err (!%p1524_p1)
}
  0x26   : > { %s1682_s26 = smov 256   ;;  %s1683_s10 = smov 16  }
  0x27   : > { %s2527_s1 = sld [smem:[#allocation15_spill]]  ;;  %s1539_s20 = scalar_lea.vmem %s267_s24, 8192 }
  0x28   : > { %p1540_p4 = scmp.ne.s32.totalorder %s267_s24, %s1539_s20  ;;  %p1547_p11 = scmp.lt.s32.totalorder %s267_s24, %s267_s24 }
  0x29   : > { %p1548_p6 = scmp.lt.s32.totalorder %s1539_s20, %s1539_s20 }
  0x2a   : > { %p1542_p3 = pnand %p1540_p4, %p1504_p0 }
  0x2b   : > { %p1549_p9 = por %p1548_p6, %p1547_p11 }
  0x2c   : > { %p1543_p7 = pneg %p1542_p3 }
  0x2d   : > { %1408 = dma.hbm_to_vmem [thread:$0]  (!%p1806_p2), %s2527_s1, 8192, %s251_s21, [#allocation6], %s1682_s26, %s1682_s26, %s1683_s10  }
  0x2e   : > { %p1550_p12 = pnand %p1549_p9, %p1543_p7 }
  0x30   : > { %1553 = shalt.err (!%p1550_p12)
}
  0x31   : > { %s2528_s3 = sld [smem:[#allocation16_spill]]  ;;  %p1353_p8 = scmp.ge.s32.totalorder %s1678_s30, 2 }
  0x33   : > { %285 = sbr.rel (%p1353_p8) target bundleno = 90 (0x5a), region = 40 }
  0x37   : > { %1411 = dma.hbm_to_vmem [thread:$0]  (!%p1806_p2), %s2528_s3, 8192, %s267_s24, [#allocation6], %s1682_s26, %s1682_s26, %s1683_s10  }
  0x38   : > { %288 = sbr.rel (!%p1777_p5) target bundleno = 90 (0x5a), region = 44  ;;  %s289_s21 = sand.u32 (%p1777_p5), 1, %s1674_s29  }
  0x39   : > { %s294_s12 = smul.u32 (%p1777_p5), 9, %s1678_s30  ;;  %s1838_s26 = scalar_lea.sflag (%p1777_p5), [#allocation3], %s289_s21 }
  0x3a   : > { %s1392_s13 = smul.u32 (%p1777_p5), 144, %s289_s21 }
  0x3b   : > { %s295_s20 = ssub.s32 (%p1777_p5), 17, %s294_s12 }
  0x3c   : > { %p296_p4 = scmp.lt.s32.totalorder (%p1777_p5), %s295_s20, 9  ;;  %s293_s10 = scalar_lea.vmem (%p1777_p5), [#allocation2], %s1392_s13 }
  0x3e   : > { %s2540_s20 = smov (!%p296_p4, %s295_s20), 9 }
  0x3f   : > { %s1835_s22 = sshll.u32 %s2540_s20, 8 }
  0x40   : > { %s301_s24 = ssub.s32 2304, %s1835_s22 }
  0x41   : > { %302 = vsyncadd %s1838_s26, %s301_s24  ;;  %p1356_p5 = scmp.ne.s32.totalorder %s1835_s22, 0  ;;  %s1389_s15 = smul.u32 2304, %s1678_s30 }
  0x42   : > { %s308_s23 = sshll.u32 %s293_s10, 4  ;;  %s1558_s24 = scalar_lea.hbm %s2508_s0, 4352  ;;  %s1848_s23 = int_to_ptr.vmem [resolvable:$true] %s308_s23 }
  0x43   : > { %s1846_s1 = scalar_lea.hbm %s2508_s0, %s1389_s15 }
  0x44   : > { %s1554_s21 = scalar_lea.hbm %s1846_s1, %s1835_s22  ;;  %p1559_p0 = scmp.lt.s32.totalorder %s1846_s1, %s2508_s0 }
  0x45   : > { %p1555_p6 = scmp.ne.s32.totalorder %s1846_s1, %s1554_s21  ;;  %p1560_p10 = scmp.lt.s32.totalorder %s1558_s24, %s1554_s21 }
  0x47   : > { %p1556_p11 = pnand %p1555_p6, %p1356_p5  ;;  %p1561_p1 = por %p1560_p10, %p1559_p0 }
  0x49   : > { %p1557_p2 = pneg %p1556_p11 }
  0x4b   : > { %p1562_p3 = pnand %p1561_p1, %p1557_p2 }
  0x4d   : > { %1565 = shalt.err (!%p1562_p3)
}
  0x4e   : > { %s1566_s15 = scalar_lea.vmem %s1848_s23, %s1835_s22  ;;  %s1684_s25 = smov [#allocation2]  }
  0x4f   : > { %p1567_p7 = scmp.ne.s32.totalorder %s1848_s23, %s1566_s15  ;;  %s1570_s12 = sshll.u32 %s1684_s25, 4  ;;  %s1571_s12 = int_to_ptr.vmem [resolvable:$false] %s1570_s12 }
  0x50   : > { %s1572_s13 = scalar_lea.vmem %s1571_s12, 4608  ;;  %p1573_p4 = scmp.lt.s32.totalorder %s1848_s23, %s1571_s12 }
  0x51   : > { %p1568_p9 = pnand %p1567_p7, %p1356_p5  ;;  %p1574_p6 = scmp.lt.s32.totalorder %s1572_s13, %s1566_s15 }
  0x53   : > { %p1569_p12 = pneg %p1568_p9  ;;  %p1575_p11 = por %p1574_p6, %p1573_p4 }
  0x55   : > { %p1576_p0 = pnand %p1575_p11, %p1569_p12 }
  0x57   : > { %1579 = shalt.err (!%p1576_p0)
}
  0x58   : > { %s1685_s3 = smov 256   ;;  %s1686_s21 = smov 16  }
  0x59   : > { %314 = dma.hbm_to_vmem [thread:$0]  (%p1356_p5), %s1846_s1, %s1835_s22, %s1848_s23, %s1838_s26, %s1685_s3, %s1685_s3, %s1686_s21  }
  0x5a PF: > { %320 = sbr.rel (%p1798_p13) target bundleno = 988 (0x3dc), region = 48  ;;  %s1877_s20 = sand.u32 (!%p1798_p13), 1, %s1670_s28  }
  0x5b   : > { %s1880_s24 = smul.u32 (!%p1798_p13), 144, %s1877_s20  ;;  %s323_s10 = scalar_lea.sflag (!%p1798_p13), [#allocation3], %s1877_s20 }
  0x5c   : > { %p2529_p2 = scmp.ne.s32.totalorder (!%p1798_p13), %s2522_s16, 0 }
  0x5d   : > { %s1884_s15 = scalar_lea.vmem (!%p1798_p13), [#allocation2], %s1880_s24 }
  0x5f   : > { %1649 = dma.done.wait (%p2529_p2), %s323_s10, 2304  }
  0x60   : > { %1651 = vsyncadd (%p2529_p2), %s323_s10, 4294964992  ;;  %p2530_p5 = scmp.eq.s32.totalorder %s1759_s9, 0 }
  0x62   : > { %1653 = dma.done.wait (%p2530_p5), [#allocation6], 16384   ;;  %p2531_p13 = pmov %p2530_p5 }
  0x63   : > { %v439_v0 = vld [vmem:[#allocation5 + $0xf8] sm:$0xff]  ;;  %v438_v1 = vld [vmem:[#allocation5 + $0xf0] sm:$0xff]  ;;  %v437_v2 = vld [vmem:[#allocation5 + $0xe8] sm:$0xff]  ;;  %s2193_s13 = scalar_lea.vmem [#allocation8], %s1880_s24  ;;  %s2366_s3 = scalar_lea.vmem [#allocation9], %s1880_s24 }
  0x64   : > { %1655 = vsyncadd (%p2531_p13), [#allocation6], 4294950912  ;;  %484 = vmatprep.subr.mxu0 %v439_v0  ;;  %v436_v3 = vld [vmem:[#allocation5 + $0xe0] sm:$0xff]  ;;  %v435_v4 = vld [vmem:[#allocation5 + $0xd8] sm:$0xff]  ;;  %s1175_s21 = scalar_lea.sflag [#allocation4], %s1877_s20  ;;  %s1180_s24 = scalar_lea.sflag [#allocation10], %s1877_s20 }
  0x65   : > { %485 = vmatpush1.msra.mxu0 %v438_v1  ;;  %v434_v5 = vld [vmem:[#allocation5 + $0xd0] sm:$0xff]  ;;  %v433_v6 = vld [vmem:[#allocation5 + $0xc8] sm:$0xff]  ;;  %v432_v7 = vld [vmem:[#allocation5 + $0xc0] sm:$0xff]  ;;  %p2532_p10 = scmp.ne.s32.totalorder %s2523_s17, 0 }
  0x66   : > { %486 = vmatprep.subr.mxu0 %v437_v2  ;;  %v431_v8 = vld [vmem:[#allocation5 + $0xb8] sm:$0xff]  ;;  %v430_v9 = vld [vmem:[#allocation5 + $0xb0] sm:$0xff]  ;;  %v429_v10 = vld [vmem:[#allocation5 + $0xa8] sm:$0xff]  ;;  %s1187_s10 = smul.u32 (%p2532_p10), 9, %s1759_s9 }
  0x67   : > { %487 = vmatpush1.msra.mxu0 %v436_v3  ;;  %v428_v11 = vld [vmem:[#allocation5 + $0xa0] sm:$0xff]  ;;  %v427_v12 = vld [vmem:[#allocation5 + $0x98] sm:$0xff]  ;;  %v426_v13 = vld [vmem:[#allocation5 + $0x90] sm:$0xff] }
  0x68   : > { %488 = vmatprep.subr.mxu0 %v435_v4  ;;  %v425_v14 = vld [vmem:[#allocation5 + $0x88] sm:$0xff]  ;;  %v424_v15 = vld [vmem:[#allocation5 + $0x80] sm:$0xff]  ;;  %v423_v16 = vld [vmem:[#allocation5 + $0x78] sm:$0xff] }
  0x69   : > { %489 = vmatpush1.msra.mxu0 %v434_v5  ;;  %v422_v17 = vld [vmem:[#allocation5 + $0x70] sm:$0xff]  ;;  %v421_v18 = vld [vmem:[#allocation5 + $0x68] sm:$0xff]  ;;  %v420_v19 = vld [vmem:[#allocation5 + $0x60] sm:$0xff] }
  0x6a   : > { %490 = vmatprep.subr.mxu0 %v433_v6  ;;  %v419_v20 = vld [vmem:[#allocation5 + $0x58] sm:$0xff]  ;;  %v418_v21 = vld [vmem:[#allocation5 + $0x50] sm:$0xff]  ;;  %v417_v22 = vld [vmem:[#allocation5 + $0x48] sm:$0xff] }
  0x6b   : > { %491 = vmatpush1.msra.mxu0 %v432_v7  ;;  %v416_v23 = vld [vmem:[#allocation5 + $0x40] sm:$0xff]  ;;  %v391_v24 = vld [vmem:[%s1884_s15 + $0x8] sm:$0xff]  ;;  %v414_v26 = vld [vmem:[#allocation5 + $0x30] sm:$0xff] }
  0x6c   : > { %492 = vmatprep.subr.mxu0 %v431_v8  ;;  %v415_v25 = vld [vmem:[#allocation5 + $0x38] sm:$0xff]  ;;  %548 = vmatprep.mubr.f32.mxu0 %v391_v24  ;;  %v413_v27 = vld [vmem:[#allocation5 + $0x28] sm:$0xff]  ;;  %v412_v28 = vld [vmem:[#allocation5 + $0x20] sm:$0xff] }
  0x6d   : > { %493 = vmatpush1.msra.mxu0 %v430_v9  ;;  %v411_v29 = vld [vmem:[#allocation5 + $0x18] sm:$0xff]  ;;  %v410_v30 = vld [vmem:[#allocation5 + $0x10] sm:$0xff]  ;;  %v409_v33 = vld [vmem:[#allocation5 + $0x8] sm:$0xff] }
  0x6e   : > { %494 = vmatprep.subr.mxu0 %v429_v10  ;;  %v652_v31 = vld [vmem:[#allocation7 + $0xf8] sm:$0xff]  ;;  %v651_v32 = vld [vmem:[#allocation7 + $0xf0] sm:$0xff]  ;;  %v650_v34 = vld [vmem:[#allocation7 + $0xe8] sm:$0xff] }
  0x6f   : > { %495 = vmatpush1.msra.mxu0 %v428_v11  ;;  %697 = vmatprep.subr.mxu1 %v652_v31  ;;  %v649_v35 = vld [vmem:[#allocation7 + $0xe0] sm:$0xff]  ;;  %v648_v37 = vld [vmem:[#allocation7 + $0xd8] sm:$0xff]  ;;  %v647_v39 = vld [vmem:[#allocation7 + $0xd0] sm:$0xff] }
  0x70   : > { %496 = vmatprep.subr.mxu0 %v427_v12  ;;  %v408_v36 = vld [vmem:[#allocation5] sm:$0xff]  ;;  %698 = vmatpush1.msra.mxu1 %v651_v32  ;;  %v471_v38 = vld [vmem:[#allocation5 + $0x1f8] sm:$0xff]  ;;  %v470_v40 = vld [vmem:[#allocation5 + $0x1f0] sm:$0xff] }
  0x71   : > { %497 = vmatpush1.msra.mxu0 %v426_v13  ;;  %699 = vmatprep.subr.mxu1 %v650_v34  ;;  %v646_v41 = vld [vmem:[#allocation7 + $0xc8] sm:$0xff]  ;;  %v645_v43 = vld [vmem:[#allocation7 + $0xc0] sm:$0xff]  ;;  %v644_v45 = vld [vmem:[#allocation7 + $0xb8] sm:$0xff] }
  0x72   : > { %498 = vmatprep.subr.mxu0 %v425_v14  ;;  %700 = vmatpush1.msra.mxu1 %v649_v35  ;;  %v469_v42 = vld [vmem:[#allocation5 + $0x1e8] sm:$0xff]  ;;  %v468_v44 = vld [vmem:[#allocation5 + $0x1e0] sm:$0xff]  ;;  %v467_v46 = vld [vmem:[#allocation5 + $0x1d8] sm:$0xff] }
  0x73   : > { %499 = vmatpush1.msra.mxu0 %v424_v15  ;;  %701 = vmatprep.subr.mxu1 %v648_v37  ;;  %v643_v47 = vld [vmem:[#allocation7 + $0xb0] sm:$0xff]  ;;  %v642_v49 = vld [vmem:[#allocation7 + $0xa8] sm:$0xff]  ;;  %v641_v51 = vld [vmem:[#allocation7 + $0xa0] sm:$0xff] }
  0x74   : > { %500 = vmatprep.subr.mxu0 %v423_v16  ;;  %702 = vmatpush1.msra.mxu1 %v647_v39  ;;  %v466_v48 = vld [vmem:[#allocation5 + $0x1d0] sm:$0xff]  ;;  %v465_v50 = vld [vmem:[#allocation5 + $0x1c8] sm:$0xff]  ;;  %v464_v52 = vld [vmem:[#allocation5 + $0x1c0] sm:$0xff] }
  0x75   : > { %501 = vmatpush1.msra.mxu0 %v422_v17  ;;  %703 = vmatprep.subr.mxu1 %v646_v41  ;;  %v640_v53 = vld [vmem:[#allocation7 + $0x98] sm:$0xff]  ;;  %v639_v55 = vld [vmem:[#allocation7 + $0x90] sm:$0xff]  ;;  %v638_v57 = vld [vmem:[#allocation7 + $0x88] sm:$0xff] }
  0x76   : > { %502 = vmatprep.subr.mxu0 %v421_v18  ;;  %704 = vmatpush1.msra.mxu1 %v645_v43  ;;  %v463_v54 = vld [vmem:[#allocation5 + $0x1b8] sm:$0xff]  ;;  %v462_v56 = vld [vmem:[#allocation5 + $0x1b0] sm:$0xff]  ;;  %v461_v58 = vld [vmem:[#allocation5 + $0x1a8] sm:$0xff] }
  0x77   : > { %503 = vmatpush1.msra.mxu0 %v420_v19  ;;  %705 = vmatprep.subr.mxu1 %v644_v45  ;;  %v637_v59 = vld [vmem:[#allocation7 + $0x80] sm:$0xff]  ;;  %v636_v61 = vld [vmem:[#allocation7 + $0x78] sm:$0xff]  ;;  %v635_v63 = vld [vmem:[#allocation7 + $0x70] sm:$0xff] }
  0x78   : > { %504 = vmatprep.subr.mxu0 %v419_v20  ;;  %706 = vmatpush1.msra.mxu1 %v643_v47  ;;  %v460_v60 = vld [vmem:[#allocation5 + $0x1a0] sm:$0xff]  ;;  %v459_v62 = vld [vmem:[#allocation5 + $0x198] sm:$0xff]  ;;  %v458_v0 = vld [vmem:[#allocation5 + $0x190] sm:$0xff] }
  0x79   : > { %505 = vmatpush1.msra.mxu0 %v418_v21  ;;  %707 = vmatprep.subr.mxu1 %v642_v49  ;;  %v634_v1 = vld [vmem:[#allocation7 + $0x68] sm:$0xff]  ;;  %v633_v3 = vld [vmem:[#allocation7 + $0x60] sm:$0xff]  ;;  %v632_v5 = vld [vmem:[#allocation7 + $0x58] sm:$0xff] }
  0x7a   : > { %506 = vmatprep.subr.mxu0 %v417_v22  ;;  %708 = vmatpush1.msra.mxu1 %v641_v51  ;;  %v457_v2 = vld [vmem:[#allocation5 + $0x188] sm:$0xff]  ;;  %v456_v4 = vld [vmem:[#allocation5 + $0x180] sm:$0xff]  ;;  %v455_v6 = vld [vmem:[#allocation5 + $0x178] sm:$0xff] }
  0x7b   : > { %507 = vmatpush1.msra.mxu0 %v416_v23  ;;  %709 = vmatprep.subr.mxu1 %v640_v53  ;;  %v631_v7 = vld [vmem:[#allocation7 + $0x50] sm:$0xff]  ;;  %v630_v9 = vld [vmem:[#allocation7 + $0x48] sm:$0xff]  ;;  %v629_v11 = vld [vmem:[#allocation7 + $0x40] sm:$0xff] }
  0x7c   : > { %508 = vmatprep.subr.mxu0 %v415_v25  ;;  %710 = vmatpush1.msra.mxu1 %v639_v55  ;;  %v454_v8 = vld [vmem:[#allocation5 + $0x170] sm:$0xff]  ;;  %v453_v10 = vld [vmem:[#allocation5 + $0x168] sm:$0xff]  ;;  %v452_v12 = vld [vmem:[#allocation5 + $0x160] sm:$0xff] }
  0x7d   : > { %509 = vmatpush1.msra.mxu0 %v414_v26  ;;  %711 = vmatprep.subr.mxu1 %v638_v57  ;;  %v628_v13 = vld [vmem:[#allocation7 + $0x38] sm:$0xff]  ;;  %v627_v15 = vld [vmem:[#allocation7 + $0x30] sm:$0xff]  ;;  %v626_v17 = vld [vmem:[#allocation7 + $0x28] sm:$0xff] }
  0x7e   : > { %510 = vmatprep.subr.mxu0 %v413_v27  ;;  %712 = vmatpush1.msra.mxu1 %v637_v59  ;;  %v451_v14 = vld [vmem:[#allocation5 + $0x158] sm:$0xff]  ;;  %v450_v16 = vld [vmem:[#allocation5 + $0x150] sm:$0xff]  ;;  %v449_v18 = vld [vmem:[#allocation5 + $0x148] sm:$0xff] }
  0x7f   : > { %511 = vmatpush1.msra.mxu0 %v412_v28  ;;  %713 = vmatprep.subr.mxu1 %v636_v61  ;;  %v625_v19 = vld [vmem:[#allocation7 + $0x20] sm:$0xff]  ;;  %v624_v21 = vld [vmem:[#allocation7 + $0x18] sm:$0xff]  ;;  %v623_v23 = vld [vmem:[#allocation7 + $0x10] sm:$0xff] }
  0x80   : > { %512 = vmatprep.subr.mxu0 %v411_v29  ;;  %714 = vmatpush1.msra.mxu1 %v635_v63  ;;  %v448_v20 = vld [vmem:[#allocation5 + $0x140] sm:$0xff]  ;;  %v447_v22 = vld [vmem:[#allocation5 + $0x138] sm:$0xff]  ;;  %v446_v24 = vld [vmem:[#allocation5 + $0x130] sm:$0xff] }
  0x81   : > { %513 = vmatpush1.msra.mxu0 %v410_v30  ;;  %715 = vmatprep.subr.mxu1 %v634_v1  ;;  %v622_v25 = vld [vmem:[#allocation7 + $0x8] sm:$0xff]  ;;  %v621_v27 = vld [vmem:[#allocation7] sm:$0xff]  ;;  %v684_v29 = vld [vmem:[#allocation7 + $0x1f8] sm:$0xff] }
  0x82   : > { %514 = vmatprep.subr.mxu0 %v409_v33  ;;  %716 = vmatpush1.msra.mxu1 %v633_v3  ;;  %v445_v26 = vld [vmem:[#allocation5 + $0x128] sm:$0xff]  ;;  %v444_v28 = vld [vmem:[#allocation5 + $0x120] sm:$0xff]  ;;  %v443_v30 = vld [vmem:[#allocation5 + $0x118] sm:$0xff] }
  0x83   : > { %515 = vmatpush1.msra.mxu0 %v408_v36  ;;  %717 = vmatprep.subr.mxu1 %v632_v5  ;;  %v683_v31 = vld [vmem:[#allocation7 + $0x1f0] sm:$0xff]  ;;  %v682_v33 = vld [vmem:[#allocation7 + $0x1e8] sm:$0xff]  ;;  %v681_v35 = vld [vmem:[#allocation7 + $0x1e0] sm:$0xff] }
  0x84   : > { %516 = vmatprep.subr.mxu0 %v471_v38  ;;  %718 = vmatpush1.msra.mxu1 %v631_v7  ;;  %v442_v32 = vld [vmem:[#allocation5 + $0x110] sm:$0xff]  ;;  %v441_v34 = vld [vmem:[#allocation5 + $0x108] sm:$0xff]  ;;  %v440_v36 = vld [vmem:[#allocation5 + $0x100] sm:$0xff] }
  0x85   : > { %517 = vmatpush2.msra.mxu0 %v470_v40  ;;  %719 = vmatprep.subr.mxu1 %v630_v9  ;;  %v680_v37 = vld [vmem:[#allocation7 + $0x1d8] sm:$0xff]  ;;  %v390_v38 = vld [vmem:[%s1884_s15] sm:$0xff]  ;;  %v678_v41 = vld [vmem:[#allocation7 + $0x1c8] sm:$0xff] }
  0x86   : > { %518 = vmatprep.subr.mxu0 %v469_v42  ;;  %720 = vmatpush1.msra.mxu1 %v629_v11  ;;  %v679_v39 = vld [vmem:[#allocation7 + $0x1d0] sm:$0xff]  ;;  %v393_v40 = vld [vmem:[%s1884_s15 + $0x18] sm:$0xff]  ;;  %v677_v42 = vld [vmem:[#allocation7 + $0x1c0] sm:$0xff] }
  0x87   : > { %519 = vmatpush2.msra.mxu0 %v468_v44  ;;  %721 = vmatprep.subr.mxu1 %v628_v13  ;;  %v676_v43 = vld [vmem:[#allocation7 + $0x1b8] sm:$0xff]  ;;  %v392_v44 = vld [vmem:[%s1884_s15 + $0x10] sm:$0xff]  ;;  %v674_v47 = vld [vmem:[#allocation7 + $0x1a8] sm:$0xff] }
  0x88   : > { %520 = vmatprep.subr.mxu0 %v467_v46  ;;  %722 = vmatpush1.msra.mxu1 %v627_v15  ;;  %v675_v45 = vld [vmem:[#allocation7 + $0x1b0] sm:$0xff]  ;;  %v395_v46 = vld [vmem:[%s1884_s15 + $0x28] sm:$0xff]  ;;  %v657_v13 = vld [vmem:[#allocation7 + $0x120] sm:$0xff] }
  0x89   : > { %521 = vmatpush2.msra.mxu0 %v466_v48  ;;  %723 = vmatprep.subr.mxu1 %v626_v17  ;;  %v673_v48 = vld [vmem:[#allocation7 + $0x1a0] sm:$0xff]  ;;  %v672_v49 = vld [vmem:[#allocation7 + $0x198] sm:$0xff]  ;;  %v671_v51 = vld [vmem:[#allocation7 + $0x190] sm:$0xff] }
  0x8a   : > { %522 = vmatprep.subr.mxu0 %v465_v50  ;;  %724 = vmatpush1.msra.mxu1 %v625_v19  ;;  %v394_v50 = vld [vmem:[%s1884_s15 + $0x20] sm:$0xff]  ;;  %v670_v53 = vld [vmem:[#allocation7 + $0x188] sm:$0xff]  ;;  %v668_v55 = vld [vmem:[#allocation7 + $0x178] sm:$0xff] }
  0x8b   : > { %523 = vmatpush2.msra.mxu0 %v464_v52  ;;  %725 = vmatprep.subr.mxu1 %v624_v21  ;;  %v397_v52 = vld [vmem:[%s1884_s15 + $0x38] sm:$0xff]  ;;  %v667_v57 = vld [vmem:[#allocation7 + $0x170] sm:$0xff]  ;;  %v653_v17 = vld [vmem:[#allocation7 + $0x100] sm:$0xff] }
  0x8c   : > { %524 = vmatprep.subr.mxu0 %v463_v54  ;;  %726 = vmatpush1.msra.mxu1 %v623_v23  ;;  %v669_v54 = vld [vmem:[#allocation7 + $0x180] sm:$0xff]  ;;  %v666_v59 = vld [vmem:[#allocation7 + $0x168] sm:$0xff]  ;;  %v664_v61 = vld [vmem:[#allocation7 + $0x158] sm:$0xff] }
  0x8d   : > { %525 = vmatpush2.msra.mxu0 %v462_v56  ;;  %727 = vmatprep.subr.mxu1 %v622_v25  ;;  %v396_v56 = vld [vmem:[%s1884_s15 + $0x30] sm:$0xff]  ;;  %v662_v1 = vld [vmem:[#allocation7 + $0x148] sm:$0xff]  ;;  %v402_v5 = vld [vmem:[%s1884_s15 + $0x60] sm:$0xff] }
  0x8e   : > { %526 = vmatprep.subr.mxu0 %v461_v58  ;;  %728 = vmatpush1.msra.mxu1 %v621_v27  ;;  %v399_v58 = vld [vmem:[%s1884_s15 + $0x48] sm:$0xff]  ;;  %v663_v63 = vld [vmem:[#allocation7 + $0x150] sm:$0xff]  ;;  %v472_v21 = vld [vmem:[%s2510_s2] sm:$0x3] }
  0x8f   : > { %527 = vmatpush2.msra.mxu0 %v460_v60  ;;  %729 = vmatprep.subr.mxu1 %v684_v29  ;;  %v665_v60 = vld [vmem:[#allocation7 + $0x160] sm:$0xff]  ;;  %v659_v11 = vld [vmem:[#allocation7 + $0x130] sm:$0xff] }
  0x90   : > { %528 = vmatprep.subr.mxu0 %v459_v62  ;;  %730 = vmatpush2.msra.mxu1 %v683_v31  ;;  %v398_v62 = vld [vmem:[%s1884_s15 + $0x40] sm:$0xff]  ;;  %v400_v3 = vld [vmem:[%s1884_s15 + $0x50] sm:$0xff] }
  0x91   : > { %529 = vmatpush2.msra.mxu0 %v458_v0  ;;  %731 = vmatprep.subr.mxu1 %v682_v33  ;;  %v401_v0 = vld [vmem:[%s1884_s15 + $0x58] sm:$0xff]  ;;  %v404_v7 = vld [vmem:[%s1884_s15 + $0x70] sm:$0xff]  ;;  %v406_v9 = vld [vmem:[%s1884_s15 + $0x80] sm:$0xff] }
  0x92   : > { %530 = vmatprep.subr.mxu0 %v457_v2  ;;  %732 = vmatpush2.msra.mxu1 %v681_v35  ;;  %v661_v2 = vld [vmem:[#allocation7 + $0x140] sm:$0xff]  ;;  %v655_v15 = vld [vmem:[#allocation7 + $0x110] sm:$0xff] }
  0x93   : > { %531 = vmatpush2.msra.mxu0 %v456_v4  ;;  %733 = vmatprep.subr.mxu1 %v680_v37  ;;  %v403_v4 = vld [vmem:[%s1884_s15 + $0x68] sm:$0xff] }
  0x94   : > { %532 = vmatprep.subr.mxu0 %v455_v6  ;;  %734 = vmatpush2.msra.mxu1 %v679_v39  ;;  %v405_v6 = vld [vmem:[%s1884_s15 + $0x78] sm:$0xff] }
  0x95   : > { %533 = vmatpush2.msra.mxu0 %v454_v8  ;;  %735 = vmatprep.subr.mxu1 %v678_v41  ;;  %v407_v8 = vld [vmem:[%s1884_s15 + $0x88] sm:$0xff]  ;;  %s1188_s15 = ssub.s32 (%p2532_p10), 17, %s1187_s10 }
  0x96   : > { %534 = vmatprep.subr.mxu0 %v453_v10  ;;  %736 = vmatpush2.msra.mxu1 %v677_v42  ;;  %v660_v10 = vld [vmem:[#allocation7 + $0x138] sm:$0xff]  ;;  %p1189_p1 = scmp.lt.s32.totalorder (%p2532_p10), %s1188_s15, 9 }
  0x97   : > { %535 = vmatpush2.msra.mxu0 %v452_v12  ;;  %737 = vmatprep.subr.mxu1 %v676_v43  ;;  %v658_v12 = vld [vmem:[#allocation7 + $0x128] sm:$0xff] }
  0x98   : > { %536 = vmatprep.subr.mxu0 %v451_v14  ;;  %738 = vmatpush2.msra.mxu1 %v675_v45  ;;  %v656_v14 = vld [vmem:[#allocation7 + $0x118] sm:$0xff] }
  0x99   : > { %537 = vmatpush2.msra.mxu0 %v450_v16  ;;  %739 = vmatprep.subr.mxu1 %v674_v47  ;;  %v654_v16 = vld [vmem:[#allocation7 + $0x108] sm:$0xff] }
  0x9a   : > { %538 = vmatprep.subr.mxu0 %v449_v18  ;;  %740 = vmatpush2.msra.mxu1 %v673_v48  ;;  %v474_v18 = vlaneseq }
  0x9b   : > { %539 = vmatpush2.msra.mxu0 %v448_v20  ;;  %741 = vmatprep.subr.mxu1 %v672_v49 }
  0x9c   : > { %540 = vmatprep.subr.mxu0 %v447_v22  ;;  %742 = vmatpush2.msra.mxu1 %v671_v51  ;;  %v475_v19 = vshrl.u32 %v474_v18, 7 }
  0x9d   : > { %541 = vmatpush2.msra.mxu0 %v446_v24  ;;  %743 = vmatprep.subr.mxu1 %v670_v53 }
  0x9e   : > { %542 = vmatprep.subr.mxu0 %v445_v26  ;;  %744 = vmatpush2.msra.mxu1 %v669_v54  ;;  %v1912_v20 = vsub.s32 0, %v475_v19  ;;  %v1917_v22 = vsub.s32 1, %v475_v19 }
  0x9f   : > { %543 = vmatpush2.msra.mxu0 %v444_v28  ;;  %745 = vmatprep.subr.mxu1 %v668_v55 }
  0xa0   : > { %544 = vmatprep.subr.mxu0 %v443_v30  ;;  %746 = vmatpush2.msra.mxu1 %v667_v57  ;;  %v1920_v23 = vrot.slane %v472_v21, %v1912_v20  ;;  %v1923_v24 = vrot.slane %v472_v21, %v1917_v22 }
  0xa1   : > { %545 = vmatpush2.msra.mxu0 %v442_v32  ;;  %747 = vmatprep.subr.mxu1 %v666_v59 }
  0xa2   : > { %546 = vmatprep.subr.mxu0 %v441_v34  ;;  %748 = vmatpush2.msra.mxu1 %v665_v60 }
  0xa3   : > { %547 = vmatpush2.msra.mxu0 %v440_v36  ;;  %749 = vmatprep.subr.mxu1 %v664_v61 }
  0xa4   : > { %549 = vmatmul.mubr.f32.vlgmr.msra.gmra.mxu0 %v390_v38  ;;  %750 = vmatpush2.msra.mxu1 %v663_v63 }
  0xa5   : > { %554 = vmatprep.mubr.f32.mxu0 %v393_v40  ;;  %751 = vmatprep.subr.mxu1 %v662_v1 }
  0xa6   : > { %752 = vmatpush2.msra.mxu1 %v661_v2 }
  0xa7   : > { %753 = vmatprep.subr.mxu1 %v660_v10 }
  0xa8   : > { %555 = vmatmul.mubr.f32.gmra.mxu0 %v392_v44  ;;  %754 = vmatpush2.msra.mxu1 %v659_v11 }
  0xa9   : > { %560 = vmatprep.mubr.f32.mxu0 %v395_v46  ;;  %755 = vmatprep.subr.mxu1 %v658_v12 }
  0xaa   : > { %756 = vmatpush2.msra.mxu1 %v657_v13 }
  0xab   : > { %757 = vmatprep.subr.mxu1 %v656_v14 }
  0xac   : > { %561 = vmatmul.mubr.f32.gmra.mxu0 %v394_v50  ;;  %758 = vmatpush2.msra.mxu1 %v655_v15  ;;  %v685_v15 = vld [vmem:[%s2512_s4] sm:$0x3] }
  0xad   : > { %566 = vmatprep.mubr.f32.mxu0 %v397_v52  ;;  %759 = vmatprep.subr.mxu1 %v654_v16  ;;  %v2001_v16 = vrot.slane %v685_v15, %v1912_v20 }
  0xae   : > { %760 = vmatpush2.msra.mxu1 %v653_v17  ;;  %v2004_v17 = vrot.slane %v685_v15, %v1917_v22 }
  0xb0   : > { %567 = vmatmul.mubr.f32.gmra.mxu0 %v396_v56 }
  0xb1   : > { %572 = vmatprep.mubr.f32.mxu0 %v399_v58 }
  0xb4   : > { %573 = vmatmul.mubr.f32.gmra.mxu0 %v398_v62 }
  0xb5   : > { %578 = vmatprep.mubr.f32.mxu0 %v401_v0 }
  0xb8   : > { %579 = vmatmul.mubr.f32.gmra.mxu0 %v400_v3 }
  0xb9   : > { %584 = vmatprep.mubr.f32.mxu0 %v403_v4 }
  0xbc   : > { %585 = vmatmul.mubr.f32.gmra.mxu0 %v402_v5 }
  0xbd   : > { %590 = vmatprep.mubr.f32.mxu0 %v405_v6 }
  0xc0   : > { %591 = vmatmul.mubr.f32.gmra.mxu0 %v404_v7 }
  0xc1   : > { %596 = vmatprep.mubr.f32.mxu0 %v407_v8 }
  0xc4   : > { %597 = vmatmul.mubr.f32.gmra.mxu0 %v406_v9 }
 0x164   : > { %v550_v25 = vpop.f32.mrf.mxu0 }
 0x165   : > { %v1926_v26 = vadd.f32 %v550_v25, %v1920_v23 }
 0x166   : > { %v552_v27 = vpop.f32.mrf.mxu0 }
 0x167   : > { %v1929_v28 = vadd.f32 %v552_v27, %v1923_v24  ;;  %v603_v31 = vmax.f32 %v1926_v26, 0.0 }
 0x168   : > { %v556_v29 = vpop.f32.mrf.mxu0 }
 0x169   : > { %v604_v30 = vmax.f32 %v1929_v28, 0.0  ;;  %v1934_v32 = vadd.f32 %v556_v29, %v1920_v23 }
 0x16a   : > { %v558_v33 = vpop.f32.mrf.mxu0 }
 0x16b   : > { %v1937_v34 = vadd.f32 %v558_v33, %v1923_v24  ;;  %761 = vmatprep.mubr.f32.mxu1 %v604_v30  ;;  %v605_v37 = vmax.f32 %v1934_v32, 0.0 }
 0x16c   : > { %v562_v35 = vpop.f32.mrf.mxu0  ;;  %762 = vmatmul.mubr.f32.vlgmr.msra.gmra.mxu1 %v603_v31 }
 0x16d   : > { %v606_v36 = vmax.f32 %v1937_v34, 0.0  ;;  %v1942_v38 = vadd.f32 %v562_v35, %v1920_v23 }
 0x16e   : > { %v564_v39 = vpop.f32.mrf.mxu0 }
 0x16f   : > { %v1945_v40 = vadd.f32 %v564_v39, %v1923_v24  ;;  %767 = vmatprep.mubr.f32.mxu1 %v606_v36  ;;  %v607_v43 = vmax.f32 %v1942_v38, 0.0 }
 0x170   : > { %v568_v41 = vpop.f32.mrf.mxu0  ;;  %768 = vmatmul.mubr.f32.gmra.mxu1 %v605_v37 }
 0x171   : > { %v608_v42 = vmax.f32 %v1945_v40, 0.0  ;;  %v1950_v44 = vadd.f32 %v568_v41, %v1920_v23 }
 0x172   : > { %v570_v45 = vpop.f32.mrf.mxu0 }
 0x173   : > { %v1953_v46 = vadd.f32 %v570_v45, %v1923_v24  ;;  %773 = vmatprep.mubr.f32.mxu1 %v608_v42  ;;  %v609_v49 = vmax.f32 %v1950_v44, 0.0 }
 0x174   : > { %v574_v47 = vpop.f32.mrf.mxu0  ;;  %774 = vmatmul.mubr.f32.gmra.mxu1 %v607_v43 }
 0x175   : > { %v610_v48 = vmax.f32 %v1953_v46, 0.0  ;;  %v1958_v50 = vadd.f32 %v574_v47, %v1920_v23 }
 0x176   : > { %v576_v51 = vpop.f32.mrf.mxu0 }
 0x177   : > { %v1961_v52 = vadd.f32 %v576_v51, %v1923_v24  ;;  %779 = vmatprep.mubr.f32.mxu1 %v610_v48  ;;  %v611_v55 = vmax.f32 %v1958_v50, 0.0 }
 0x178   : > { %v580_v53 = vpop.f32.mrf.mxu0  ;;  %780 = vmatmul.mubr.f32.gmra.mxu1 %v609_v49 }
 0x179   : > { %v612_v54 = vmax.f32 %v1961_v52, 0.0  ;;  %v1966_v56 = vadd.f32 %v580_v53, %v1920_v23 }
 0x17a   : > { %v582_v57 = vpop.f32.mrf.mxu0 }
 0x17b   : > { %v1969_v58 = vadd.f32 %v582_v57, %v1923_v24  ;;  %785 = vmatprep.mubr.f32.mxu1 %v612_v54  ;;  %v613_v61 = vmax.f32 %v1966_v56, 0.0 }
 0x17c   : > { %v586_v59 = vpop.f32.mrf.mxu0  ;;  %786 = vmatmul.mubr.f32.gmra.mxu1 %v611_v55 }
 0x17d   : > { %v614_v60 = vmax.f32 %v1969_v58, 0.0  ;;  %v1974_v62 = vadd.f32 %v586_v59, %v1920_v23 }
 0x17e   : > { %v588_v63 = vpop.f32.mrf.mxu0 }
 0x17f   : > { %v1977_v0 = vadd.f32 %v588_v63, %v1923_v24  ;;  %791 = vmatprep.mubr.f32.mxu1 %v614_v60  ;;  %v615_v3 = vmax.f32 %v1974_v62, 0.0 }
 0x180   : > { %v592_v1 = vpop.f32.mrf.mxu0  ;;  %792 = vmatmul.mubr.f32.gmra.mxu1 %v613_v61 }
 0x181   : > { %v616_v2 = vmax.f32 %v1977_v0, 0.0  ;;  %v1982_v4 = vadd.f32 %v592_v1, %v1920_v23 }
 0x182   : > { %v594_v5 = vpop.f32.mrf.mxu0 }
 0x183   : > { %v1985_v6 = vadd.f32 %v594_v5, %v1923_v24  ;;  %797 = vmatprep.mubr.f32.mxu1 %v616_v2  ;;  %v617_v9 = vmax.f32 %v1982_v4, 0.0 }
 0x184   : > { %v598_v7 = vpop.f32.mrf.mxu0  ;;  %798 = vmatmul.mubr.f32.gmra.mxu1 %v615_v3 }
 0x185   : > { %v618_v8 = vmax.f32 %v1985_v6, 0.0  ;;  %v1990_v10 = vadd.f32 %v598_v7, %v1920_v23 }
 0x186   : > { %v600_v11 = vpop.f32.mrf.mxu0 }
 0x187   : > { %v1993_v12 = vadd.f32 %v600_v11, %v1923_v24  ;;  %803 = vmatprep.mubr.f32.mxu1 %v618_v8  ;;  %v619_v14 = vmax.f32 %v1990_v10, 0.0 }
 0x188   : > { %804 = vmatmul.mubr.f32.gmra.mxu1 %v617_v9 }
 0x189   : > { %v620_v13 = vmax.f32 %v1993_v12, 0.0 }
 0x18b   : > { %809 = vmatprep.mubr.f32.mxu1 %v620_v13 }
 0x18c   : > { %810 = vmatmul.mubr.f32.gmra.mxu1 %v619_v14 }
 0x22c   : > { %v763_v18 = vpop.f32.mrf.mxu1 }
 0x22d   : > { %v764_v19 = vadd.f32 %v763_v18, %v2001_v16 }
 0x22e   : > { %v765_v21 = vpop.f32.mrf.mxu1 }
 0x22f   : > { %v2008_v23 = vadd.f32 %v764_v19, %v1926_v26  ;;  %v766_v24 = vadd.f32 %v765_v21, %v2004_v17 }
 0x230   : > { %v769_v25 = vpop.f32.mrf.mxu1 }
 0x231   : > { %v2012_v27 = vadd.f32 %v766_v24, %v1929_v28  ;;  %v770_v29 = vadd.f32 %v769_v25, %v2001_v16  ;;  %v871_v35 = vmul.f32 %v2008_v23, %v2008_v23 }
 0x232   : > { %v771_v30 = vpop.f32.mrf.mxu1 }
 0x233   : > { %v772_v31 = vadd.f32 %v771_v30, %v2004_v17  ;;  %v834_v33 = vadd.f32 %v2012_v27, %v2008_v23  ;;  %v872_v26 = vmul.f32 %v2012_v27, %v2012_v27  ;;  %v2023_v36 = vadd.f32 %v770_v29, %v1934_v32 }
 0x234   : > { %v775_v37 = vpop.f32.mrf.mxu1 }
 0x235   : > { %v2026_v28 = vadd.f32 %v772_v31, %v1937_v34  ;;  %v776_v39 = vadd.f32 %v775_v37, %v2001_v16  ;;  %835 = vadd.xlane.f32.xlu0 %v834_v33  ;;  %v889_v41 = vadd.f32 %v872_v26, %v871_v35  ;;  %v873_v48 = vmul.f32 %v2023_v36, %v2023_v36 }
 0x236   : > { %v777_v42 = vpop.f32.mrf.mxu1 }
 0x237   : > { %v778_v43 = vadd.f32 %v777_v42, %v2004_v17  ;;  %890 = vadd.xlane.f32.xlu1 %v889_v41  ;;  %v837_v45 = vadd.f32 %v2026_v28, %v2023_v36  ;;  %v874_v47 = vmul.f32 %v2026_v28, %v2026_v28  ;;  %v2037_v34 = vadd.f32 %v776_v39, %v1942_v38 }
 0x238   : > { %v781_v32 = vpop.f32.mrf.mxu1 }
 0x239   : > { %v2040_v49 = vadd.f32 %v778_v43, %v1945_v40  ;;  %v782_v51 = vadd.f32 %v781_v32, %v2001_v16  ;;  %838 = vadd.xlane.f32.xlu0 %v837_v45  ;;  %v892_v54 = vadd.f32 %v874_v47, %v873_v48 }
 0x23a   : > { %v783_v53 = vpop.f32.mrf.mxu1 }
 0x23b   : > { %v2044_v55 = vadd.f32 %v782_v51, %v1950_v44  ;;  %v784_v57 = vadd.f32 %v783_v53, %v2004_v17  ;;  %v840_v59 = vadd.f32 %v2040_v49, %v2037_v34  ;;  %v876_v38 = vmul.f32 %v2040_v49, %v2040_v49 }
 0x23c   : > { %v787_v60 = vpop.f32.mrf.mxu1  ;;  %v875_v44 = vmul.f32 %v2037_v34, %v2037_v34 }
 0x23d   : > { %v2052_v40 = vadd.f32 %v784_v57, %v1953_v46  ;;  %v788_v61 = vadd.f32 %v787_v60, %v2001_v16  ;;  %841 = vadd.xlane.f32.xlu1 %v840_v59  ;;  %893 = vadd.xlane.f32.xlu0 %v892_v54  ;;  %v877_v3 = vmul.f32 %v2044_v55, %v2044_v55 }
 0x23e   : > { %v789_v63 = vpop.f32.mrf.mxu1  ;;  %v895_v2 = vadd.f32 %v876_v38, %v875_v44 }
 0x23f   : > { %v790_v1 = vadd.f32 %v789_v63, %v2004_v17  ;;  %v878_v5 = vmul.f32 %v2052_v40, %v2052_v40  ;;  %v2063_v46 = vadd.f32 %v788_v61, %v1958_v50  ;;  %v843_v18 = vadd.f32 %v2052_v40, %v2044_v55 }
 0x240   : > { %v793_v7 = vpop.f32.mrf.mxu1 }
 0x241   : > { %v2066_v8 = vadd.f32 %v790_v1, %v1961_v52  ;;  %v794_v9 = vadd.f32 %v793_v7, %v2001_v16  ;;  %896 = vadd.xlane.f32.xlu1 %v895_v2  ;;  %v898_v11 = vadd.f32 %v878_v5, %v877_v3  ;;  %v879_v24 = vmul.f32 %v2063_v46, %v2063_v46 }
 0x242   : > { %v795_v13 = vpop.f32.mrf.mxu1 }
 0x243   : > { %v2070_v14 = vadd.f32 %v794_v9, %v1966_v56  ;;  %v796_v15 = vadd.f32 %v795_v13, %v2004_v17  ;;  %899 = vadd.xlane.f32.xlu0 %v898_v11  ;;  %v880_v50 = vmul.f32 %v2066_v8, %v2066_v8  ;;  %v846_v56 = vadd.f32 %v2066_v8, %v2063_v46 }
 0x244   : > { %v799_v19 = vpop.f32.mrf.mxu1 }
 0x245   : > { %v2078_v52 = vadd.f32 %v796_v15, %v1969_v58  ;;  %v800_v21 = vadd.f32 %v799_v19, %v2001_v16  ;;  %844 = vadd.xlane.f32.xlu1 %v843_v18  ;;  %v901_v30 = vadd.f32 %v880_v50, %v879_v24  ;;  %v881_v31 = vmul.f32 %v2070_v14, %v2070_v14 }
 0x246   : > { %v801_v25 = vpop.f32.mrf.mxu1 }
 0x247   : > { %v802_v29 = vadd.f32 %v801_v25, %v2004_v17  ;;  %847 = vadd.xlane.f32.xlu0 %v846_v56  ;;  %v882_v58 = vmul.f32 %v2078_v52, %v2078_v52  ;;  %v2091_v35 = vadd.f32 %v800_v21, %v1974_v62  ;;  %v849_v42 = vadd.f32 %v2078_v52, %v2070_v14 }
 0x248   : > { %v805_v33 = vpop.f32.mrf.mxu1 }
 0x249   : > { %v2094_v26 = vadd.f32 %v802_v29, %v1977_v0  ;;  %902 = vadd.xlane.f32.xlu1 %v901_v30  ;;  %v904_v37 = vadd.f32 %v882_v58, %v881_v31  ;;  %v806_v47 = vadd.f32 %v805_v33, %v2001_v16  ;;  %v883_v32 = vmul.f32 %v2091_v35, %v2091_v35 }
 0x24a   : > { %v807_v39 = vpop.f32.mrf.mxu1 }
 0x24b   : > { %v808_v41 = vadd.f32 %v807_v39, %v2004_v17  ;;  %905 = vadd.xlane.f32.xlu0 %v904_v37  ;;  %v884_v43 = vmul.f32 %v2094_v26, %v2094_v26  ;;  %v852_v0 = vadd.f32 %v2094_v26, %v2091_v35  ;;  %v2112_v57 = vadd.f32 %v806_v47, %v1982_v4 }
 0x24c   : > { %v811_v45 = vpop.f32.mrf.mxu1 }
 0x24d   : > { %v812_v62 = vadd.f32 %v811_v45, %v2001_v16  ;;  %850 = vadd.xlane.f32.xlu1 %v849_v42  ;;  %v2108_v51 = vadd.f32 %v808_v41, %v1985_v6  ;;  %v907_v54 = vadd.f32 %v884_v43, %v883_v32  ;;  %v1006_v32 = vld [vmem:[%s2513_s5] sm:$0x3] }
 0x24e   : > { %v813_v48 = vpop.f32.mrf.mxu1 }
 0x24f   : > { %v814_v53 = vadd.f32 %v813_v48, %v2004_v17  ;;  %853 = vadd.xlane.f32.xlu0 %v852_v0  ;;  %v2115_v16 = vadd.f32 %v812_v62, %v1990_v10  ;;  %v855_v38 = vadd.f32 %v2108_v51, %v2112_v57  ;;  %v886_v4 = vmul.f32 %v2108_v51, %v2108_v51 }
 0x251   : > { %v2118_v59 = vadd.f32 %v814_v53, %v1993_v12  ;;  %908 = vadd.xlane.f32.xlu1 %v907_v54  ;;  %v887_v10 = vmul.f32 %v2115_v16, %v2115_v16  ;;  %v885_v12 = vmul.f32 %v2112_v57, %v2112_v57 }
 0x253   : > { %v858_v6 = vadd.f32 %v2118_v59, %v2115_v16  ;;  %v888_v17 = vmul.f32 %v2118_v59, %v2118_v59  ;;  %v910_v61 = vadd.f32 %v886_v4, %v885_v12 }
 0x255   : > { %856 = vadd.xlane.f32.xlu1 %v855_v38  ;;  %859 = vadd.xlane.f32.xlu0 %v858_v6  ;;  %v913_v60 = vadd.f32 %v888_v17, %v887_v10  ;;  %v1036_v10 = vld [vmem:[%s2514_s6] sm:$0x3] }
 0x259   : > { %914 = vadd.xlane.f32.xlu1 %v913_v60  ;;  %911 = vadd.xlane.f32.xlu0 %v910_v61  ;;  %v2157_v60 = vrot.slane %v1006_v32, %v1912_v20  ;;  %v2160_v61 = vrot.slane %v1006_v32, %v1917_v22 }
 0x2be   : > { %v836_v44 = vpop.xlane.xlu0 %835 }
 0x2bf   : > { %v862_v63 = vmul.f32 0.00390625, %v836_v44 }
 0x2c0   : > { %v891_v1 = vpop.xlane.xlu1 %890 }
 0x2c1   : > { %v916_v2 = vmul.f32 0.00390625, %v891_v1  ;;  %v925_v3 = vmul.f32 %v862_v63, %v862_v63  ;;  %v952_v6 = vsub.f32 %v2008_v23, %v862_v63  ;;  %v953_v17 = vsub.f32 %v2012_v27, %v862_v63 }
 0x2c2   : > { %v839_v5 = vpop.xlane.xlu0 %838 }
 0x2c3   : > { %v934_v7 = vsub.f32 %v916_v2, %v925_v3  ;;  %v2132_v9 = vmul.f32 0.00390625, %v839_v5 }
 0x2c5   : > { %v943_v11 = vmax.f32 %v934_v7, 0.0  ;;  %v926_v19 = vmul.f32 %v2132_v9, %v2132_v9  ;;  %v2165_v7 = vrot.slane %v1036_v10, %v1912_v20  ;;  %v954_v20 = vsub.f32 %v2023_v36, %v2132_v9 }
 0x2c6   : > { %v842_v13 = vpop.xlane.xlu1 %841  ;;  %v894_v15 = vpop.xlane.xlu0 %893 }
 0x2c7   : > { %v970_v18 = vadd.f32 1e-05, %v943_v11  ;;  %v2134_v50 = vmul.f32 0.00390625, %v842_v13  ;;  %v917_v21 = vmul.f32 0.00390625, %v894_v15  ;;  %v2170_v15 = vrot.slane %v1036_v10, %v1917_v22 }
 0x2c9   : > { %1466 = vrsqrt.f32 %v970_v18  ;;  %v935_v56 = vsub.f32 %v917_v21, %v926_v19  ;;  %v927_v29 = vmul.f32 %v2134_v50, %v2134_v50 }
 0x2ca   : > { %v897_v24 = vpop.xlane.xlu1 %896 }
 0x2cb   : > { %v944_v25 = vmax.f32 %v935_v56, 0.0  ;;  %v918_v30 = vmul.f32 0.00390625, %v897_v24 }
 0x2cc   : > { %v900_v31 = vpop.xlane.xlu0 %899 }
 0x2cd   : > { %v971_v58 = vadd.f32 1e-05, %v944_v25  ;;  %v936_v33 = vsub.f32 %v918_v30, %v927_v29  ;;  %v919_v45 = vmul.f32 0.00390625, %v900_v31  ;;  %v955_v31 = vsub.f32 %v2026_v28, %v2132_v9 }
 0x2ce   : > { %v845_v37 = vpop.xlane.xlu1 %844 }
 0x2cf   : > { %1468 = vrsqrt.f32 %v971_v58  ;;  %v945_v39 = vmax.f32 %v936_v33, 0.0  ;;  %v2140_v41 = vmul.f32 0.00390625, %v845_v37 }
 0x2d0   : > { %v848_v42 = vpop.xlane.xlu0 %847 }
 0x2d1   : > { %v972_v43 = vadd.f32 1e-05, %v945_v39  ;;  %v928_v47 = vmul.f32 %v2140_v41, %v2140_v41  ;;  %v2144_v62 = vmul.f32 0.00390625, %v848_v42 }
 0x2d2   : > { %v903_v0 = vpop.xlane.xlu1 %902 }
 0x2d3   : > { %v937_v48 = vsub.f32 %v919_v45, %v928_v47  ;;  %v920_v53 = vmul.f32 0.00390625, %v903_v0  ;;  %1470 = vrsqrt.f32 %v972_v43  ;;  %v929_v54 = vmul.f32 %v2144_v62, %v2144_v62 }
 0x2d4   : > { %v906_v38 = vpop.xlane.xlu0 %905 }
 0x2d5   : > { %v946_v4 = vmax.f32 %v937_v48, 0.0  ;;  %v938_v44 = vsub.f32 %v920_v53, %v929_v54  ;;  %v921_v11 = vmul.f32 0.00390625, %v906_v38 }
 0x2d6   : > { %v1467_v12 = vpop.eup %1466  ;;  %v851_v1 = vpop.xlane.xlu1 %850 }
 0x2d7   : > { %v973_v2 = vadd.f32 1e-05, %v946_v4  ;;  %v2162_v3 = vmul.f32 0.00390625, %v851_v1  ;;  %v988_v23 = vmul.f32 %v1467_v12, %v952_v6  ;;  %v989_v5 = vmul.f32 %v1467_v12, %v953_v17 }
 0x2d8   : > { %v947_v27 = vmax.f32 %v938_v44, 0.0  ;;  %v854_v63 = vpop.xlane.xlu0 %853  ;;  %v956_v6 = vsub.f32 %v2037_v34, %v2134_v50  ;;  %v957_v17 = vsub.f32 %v2040_v49, %v2134_v50  ;;  %v958_v4 = vsub.f32 %v2044_v55, %v2140_v41 }
 0x2d9   : > { %1472 = vrsqrt.f32 %v973_v2  ;;  %v930_v13 = vmul.f32 %v2162_v3, %v2162_v3  ;;  %v2172_v19 = vmul.f32 0.00390625, %v854_v63  ;;  %v1018_v56 = vmul.f32 %v2157_v60, %v988_v23 }
 0x2da   : > { %v974_v18 = vadd.f32 1e-05, %v947_v27  ;;  %v909_v21 = vpop.xlane.xlu1 %908  ;;  %v1019_v24 = vmul.f32 %v2160_v61, %v989_v5  ;;  %v959_v63 = vsub.f32 %v2052_v40, %v2140_v41 }
 0x2db   : > { %v939_v25 = vsub.f32 %v921_v11, %v930_v13  ;;  %v922_v29 = vmul.f32 0.00390625, %v909_v21  ;;  %v931_v22 = vmul.f32 %v2172_v19, %v2172_v19  ;;  %v2183_v33 = vadd.f32 %v2165_v7, %v1018_v56 }
 0x2dc   : > { %v1469_v30 = vpop.eup %1468  ;;  %1474 = vrsqrt.f32 %v974_v18  ;;  %v2186_v37 = vadd.f32 %v2170_v15, %v1019_v24  ;;  %v960_v56 = vsub.f32 %v2063_v46, %v2144_v62 }
 0x2dd   : > { %v948_v58 = vmax.f32 %v939_v25, 0.0  ;;  %v990_v39 = vmul.f32 %v1469_v30, %v954_v20  ;;  %v940_v36 = vsub.f32 %v922_v29, %v931_v22  ;;  %v991_v45 = vmul.f32 %v1469_v30, %v955_v31  ;;  %1066 = vst [vmem:[%s2193_s13] sm:$0xff] %v2183_v33 }
 0x2de   : > { %v857_v42 = vpop.xlane.xlu1 %856  ;;  %v860_v43 = vpop.xlane.xlu0 %859  ;;  %1067 = vst [vmem:[%s2193_s13 + $0x8] sm:$0xff] %v2186_v37  ;;  %v1084_v9 = vmul.f32 %v2183_v33, %v2183_v33  ;;  %v1085_v48 = vmul.f32 %v2186_v37, %v2186_v37  ;;  %v961_v31 = vsub.f32 %v2066_v8, %v2144_v62 }
 0x2df   : > { %v975_v47 = vadd.f32 1e-05, %v948_v58  ;;  %v2188_v0 = vmul.f32 0.00390625, %v857_v42  ;;  %v2190_v28 = vmul.f32 0.00390625, %v860_v43  ;;  %v949_v32 = vmax.f32 %v940_v36, 0.0 }
 0x2e0   : > { %v1020_v53 = vmul.f32 %v2157_v60, %v990_v39  ;;  %v1021_v54 = vmul.f32 %v2160_v61, %v991_v45  ;;  %v1471_v38 = vpop.eup %1470  ;;  %v1102_v12 = vadd.f32 %v1085_v48, %v1084_v9 }
 0x2e1   : > { %1476 = vrsqrt.f32 %v975_v47  ;;  %v976_v10 = vadd.f32 1e-05, %v949_v32  ;;  %v933_v1 = vmul.f32 %v2190_v28, %v2190_v28  ;;  %v932_v34 = vmul.f32 %v2188_v0, %v2188_v0 }
 0x2e2   : > { %v915_v44 = vpop.xlane.xlu1 %914  ;;  %v912_v2 = vpop.xlane.xlu0 %911  ;;  %v2216_v49 = vadd.f32 %v2165_v7, %v1020_v53  ;;  %1103 = vadd.xlane.f32.xlu0 %v1102_v12  ;;  %v2219_v55 = vadd.f32 %v2170_v15, %v1021_v54  ;;  %v992_v50 = vmul.f32 %v1471_v38, %v956_v6  ;;  %v993_v27 = vmul.f32 %v1471_v38, %v957_v17 }
 0x2e3   : > { %v924_v23 = vmul.f32 0.00390625, %v915_v44  ;;  %v923_v5 = vmul.f32 0.00390625, %v912_v2  ;;  %1478 = vrsqrt.f32 %v976_v10  ;;  %v962_v6 = vsub.f32 %v2070_v14, %v2162_v3 }
 0x2e4   : > { %v1086_v18 = vmul.f32 %v2216_v49, %v2216_v49  ;;  %1068 = vst [vmem:[%s2193_s13 + $0x10] sm:$0xff] %v2216_v49  ;;  %1069 = vst [vmem:[%s2193_s13 + $0x18] sm:$0xff] %v2219_v55  ;;  %v1087_v24 = vmul.f32 %v2219_v55, %v2219_v55  ;;  %v1022_v20 = vmul.f32 %v2157_v60, %v992_v50 }
 0x2e5   : > { %v942_v11 = vsub.f32 %v924_v23, %v933_v1  ;;  %v941_v13 = vsub.f32 %v923_v5, %v932_v34  ;;  %v1023_v40 = vmul.f32 %v2160_v61, %v993_v27  ;;  %v963_v17 = vsub.f32 %v2078_v52, %v2162_v3 }
 0x2e6   : > { %v1473_v21 = vpop.eup %1472  ;;  %v1105_v22 = vadd.f32 %v1087_v24, %v1086_v18  ;;  %v2238_v46 = vadd.f32 %v2165_v7, %v1022_v20  ;;  %v964_v2 = vsub.f32 %v2091_v35, %v2172_v19  ;;  %v965_v23 = vsub.f32 %v2094_v26, %v2172_v19 }
 0x2e7   : > { %v994_v41 = vmul.f32 %v1473_v21, %v958_v4  ;;  %v995_v25 = vmul.f32 %v1473_v21, %v959_v63  ;;  %v951_v29 = vmax.f32 %v942_v11, 0.0  ;;  %v950_v30 = vmax.f32 %v941_v13, 0.0 }
 0x2e8   : > { %v2241_v58 = vadd.f32 %v2170_v15, %v1023_v40  ;;  %1106 = vadd.xlane.f32.xlu1 %v1105_v22  ;;  %1070 = vst [vmem:[%s2193_s13 + $0x20] sm:$0xff] %v2238_v46  ;;  %v1088_v8 = vmul.f32 %v2238_v46, %v2238_v46  ;;  %v967_v22 = vsub.f32 %v2108_v51, %v2188_v0 }
 0x2e9   : > { %v1475_v39 = vpop.eup %1474  ;;  %v1024_v36 = vmul.f32 %v2157_v60, %v994_v41  ;;  %v1025_v42 = vmul.f32 %v2160_v61, %v995_v25  ;;  %v978_v43 = vadd.f32 1e-05, %v951_v29  ;;  %v977_v45 = vadd.f32 1e-05, %v950_v30 }
 0x2ea   : > { %1071 = vst [vmem:[%s2193_s13 + $0x28] sm:$0xff] %v2241_v58  ;;  %v1089_v62 = vmul.f32 %v2241_v58, %v2241_v58  ;;  %v996_v47 = vmul.f32 %v1475_v39, %v960_v56  ;;  %v997_v9 = vmul.f32 %v1475_v39, %v961_v31  ;;  %v968_v41 = vsub.f32 %v2115_v16, %v2190_v28 }
 0x2eb   : > { %1480 = vrsqrt.f32 %v978_v43  ;;  %v2254_v32 = vadd.f32 %v2165_v7, %v1024_v36  ;;  %v2257_v48 = vadd.f32 %v2170_v15, %v1025_v42  ;;  %v969_v25 = vsub.f32 %v2118_v59, %v2190_v28 }
 0x2ec   : > { %1482 = vrsqrt.f32 %v977_v45  ;;  %v1108_v53 = vadd.f32 %v1089_v62, %v1088_v8  ;;  %v1026_v54 = vmul.f32 %v2157_v60, %v996_v47  ;;  %v1027_v38 = vmul.f32 %v2160_v61, %v997_v9 }
 0x2ed   : > { %1073 = vst [vmem:[%s2193_s13 + $0x38] sm:$0xff] %v2257_v48  ;;  %v1090_v4 = vmul.f32 %v2254_v32, %v2254_v32  ;;  %v1091_v10 = vmul.f32 %v2257_v48, %v2257_v48  ;;  %1072 = vst [vmem:[%s2193_s13 + $0x30] sm:$0xff] %v2254_v32  ;;  %v966_v31 = vsub.f32 %v2112_v57, %v2188_v0 }
 0x2ee   : > { %v1477_v12 = vpop.eup %1476  ;;  %1109 = vadd.xlane.f32.xlu0 %v1108_v53  ;;  %v2274_v44 = vadd.f32 %v2165_v7, %v1026_v54  ;;  %v2277_v14 = vadd.f32 %v2170_v15, %v1027_v38 }
 0x2ef   : > { %v998_v52 = vmul.f32 %v1477_v12, %v962_v6  ;;  %v999_v3 = vmul.f32 %v1477_v12, %v963_v17  ;;  %v1111_v1 = vadd.f32 %v1091_v10, %v1090_v4 }
 0x2f0   : > { %1075 = vst [vmem:[%s2193_s13 + $0x48] sm:$0xff] %v2277_v14  ;;  %v1092_v34 = vmul.f32 %v2274_v44, %v2274_v44  ;;  %v1093_v5 = vmul.f32 %v2277_v14, %v2277_v14  ;;  %1074 = vst [vmem:[%s2193_s13 + $0x40] sm:$0xff] %v2274_v44  ;;  %v1479_v50 = vpop.eup %1478 }
 0x2f1   : > { %v1028_v27 = vmul.f32 %v2157_v60, %v998_v52  ;;  %v1029_v35 = vmul.f32 %v2160_v61, %v999_v3  ;;  %1112 = vadd.xlane.f32.xlu1 %v1111_v1  ;;  %v1000_v26 = vmul.f32 %v1479_v50, %v964_v2  ;;  %v1001_v19 = vmul.f32 %v1479_v50, %v965_v23 }
 0x2f2   : > { %v1114_v63 = vadd.f32 %v1093_v5, %v1092_v34 }
 0x2f3   : > { %v2294_v11 = vadd.f32 %v2165_v7, %v1028_v27  ;;  %v2297_v13 = vadd.f32 %v2170_v15, %v1029_v35  ;;  %v1030_v18 = vmul.f32 %v2157_v60, %v1000_v26  ;;  %v1031_v21 = vmul.f32 %v2160_v61, %v1001_v19 }
 0x2f4   : > { %1115 = vadd.xlane.f32.xlu0 %v1114_v63 }
 0x2f5   : > { %1077 = vst [vmem:[%s2193_s13 + $0x58] sm:$0xff] %v2297_v13  ;;  %v1094_v56 = vmul.f32 %v2294_v11, %v2294_v11  ;;  %v1095_v24 = vmul.f32 %v2297_v13, %v2297_v13  ;;  %1076 = vst [vmem:[%s2193_s13 + $0x50] sm:$0xff] %v2294_v11  ;;  %v2310_v20 = vadd.f32 %v2165_v7, %v1030_v18 }
 0x2f6   : > { %v2313_v40 = vadd.f32 %v2170_v15, %v1031_v21 }
 0x2f7   : > { %v1117_v29 = vadd.f32 %v1095_v24, %v1094_v56  ;;  %v1096_v39 = vmul.f32 %v2310_v20, %v2310_v20  ;;  %1078 = vst [vmem:[%s2193_s13 + $0x60] sm:$0xff] %v2310_v20 }
 0x2f8   : > { %v1481_v30 = vpop.eup %1480  ;;  %1079 = vst [vmem:[%s2193_s13 + $0x68] sm:$0xff] %v2313_v40  ;;  %v1097_v36 = vmul.f32 %v2313_v40, %v2313_v40 }
 0x2f9   : > { %v1483_v16 = vpop.eup %1482  ;;  %1118 = vadd.xlane.f32.xlu1 %v1117_v29  ;;  %v1004_v59 = vmul.f32 %v1481_v30, %v968_v41  ;;  %v1005_v28 = vmul.f32 %v1481_v30, %v969_v25 }
 0x2fa   : > { %v1120_v57 = vadd.f32 %v1097_v36, %v1096_v39  ;;  %v1002_v42 = vmul.f32 %v1483_v16, %v966_v31  ;;  %v1003_v51 = vmul.f32 %v1483_v16, %v967_v22 }
 0x2fb   : > { %v1034_v0 = vmul.f32 %v2157_v60, %v1004_v59  ;;  %v1035_v43 = vmul.f32 %v2160_v61, %v1005_v28 }
 0x2fc   : > { %1121 = vadd.xlane.f32.xlu0 %v1120_v57  ;;  %v1032_v45 = vmul.f32 %v2157_v60, %v1002_v42  ;;  %v1033_v8 = vmul.f32 %v2160_v61, %v1003_v51 }
 0x2fd   : > { %v2336_v62 = vadd.f32 %v2165_v7, %v1034_v0  ;;  %v2339_v47 = vadd.f32 %v2170_v15, %v1035_v43 }
 0x2fe   : > { %v2342_v9 = vadd.f32 %v2165_v7, %v1032_v45  ;;  %v2345_v53 = vadd.f32 %v2170_v15, %v1033_v8 }
 0x2ff   : > { %1083 = vst [vmem:[%s2193_s13 + $0x88] sm:$0xff] %v2339_v47  ;;  %v1100_v54 = vmul.f32 %v2336_v62, %v2336_v62  ;;  %v1101_v60 = vmul.f32 %v2339_v47, %v2339_v47  ;;  %1082 = vst [vmem:[%s2193_s13 + $0x80] sm:$0xff] %v2336_v62 }
 0x300   : > { %1081 = vst [vmem:[%s2193_s13 + $0x78] sm:$0xff] %v2345_v53  ;;  %v1098_v61 = vmul.f32 %v2342_v9, %v2342_v9  ;;  %v1099_v7 = vmul.f32 %v2345_v53, %v2345_v53  ;;  %1080 = vst [vmem:[%s2193_s13 + $0x70] sm:$0xff] %v2342_v9 }
 0x301   : > { %v1126_v15 = vadd.f32 %v1101_v60, %v1100_v54 }
 0x302   : > { %v1123_v38 = vadd.f32 %v1099_v7, %v1098_v61 }
 0x303   : > { %1127 = vadd.xlane.f32.xlu0 %v1126_v15 }
 0x304   : > { %1124 = vadd.xlane.f32.xlu1 %v1123_v38 }
 0x36b   : > { %v1104_v6 = vpop.xlane.xlu0 %1103 }
 0x36c   : > { %1484 = vrsqrt.f32 %v1104_v6 }
 0x371   : > { %v1107_v17 = vpop.xlane.xlu1 %1106 }
 0x372   : > { %1486 = vrsqrt.f32 %v1107_v17 }
 0x377   : > { %v1110_v4 = vpop.xlane.xlu0 %1109 }
 0x378   : > { %1488 = vrsqrt.f32 %v1110_v4 }
 0x379   : > { %v1485_v12 = vpop.eup %1484 }
 0x37a   : > { %v1113_v10 = vpop.xlane.xlu1 %1112  ;;  %v1138_v52 = vmul.f32 %v1485_v12, %v2183_v33  ;;  %v1139_v3 = vmul.f32 %v1485_v12, %v2186_v37 }
 0x37b   : > { %1490 = vrsqrt.f32 %v1113_v10 }
 0x37c   : > { %1156 = vst [vmem:[%s2366_s3] sm:$0xff] %v1138_v52  ;;  %1157 = vst [vmem:[%s2366_s3 + $0x8] sm:$0xff] %v1139_v3 }
 0x37d   : > { %v1116_v1 = vpop.xlane.xlu0 %1115 }
 0x37e   : > { %1492 = vrsqrt.f32 %v1116_v1 }
 0x37f   : > { %v1487_v2 = vpop.eup %1486 }
 0x380   : > { %v1140_v23 = vmul.f32 %v1487_v2, %v2216_v49  ;;  %v1141_v34 = vmul.f32 %v1487_v2, %v2219_v55 }
 0x382   : > { %v1119_v33 = vpop.xlane.xlu1 %1118  ;;  %1158 = vst [vmem:[%s2366_s3 + $0x10] sm:$0xff] %v1140_v23  ;;  %1159 = vst [vmem:[%s2366_s3 + $0x18] sm:$0xff] %v1141_v34 }
 0x383   : > { %1494 = vrsqrt.f32 %v1119_v33 }
 0x385   : > { %v1489_v37 = vpop.eup %1488  ;;  %v1122_v5 = vpop.xlane.xlu0 %1121 }
 0x386   : > { %v1142_v50 = vmul.f32 %v1489_v37, %v2238_v46  ;;  %v1143_v27 = vmul.f32 %v1489_v37, %v2241_v58  ;;  %1496 = vrsqrt.f32 %v1122_v5 }
 0x388   : > { %v1491_v35 = vpop.eup %1490  ;;  %1160 = vst [vmem:[%s2366_s3 + $0x20] sm:$0xff] %v1142_v50  ;;  %1161 = vst [vmem:[%s2366_s3 + $0x28] sm:$0xff] %v1143_v27 }
 0x389   : > { %v1144_v49 = vmul.f32 %v1491_v35, %v2254_v32  ;;  %v1145_v55 = vmul.f32 %v1491_v35, %v2257_v48 }
 0x38b   : > { %v1493_v63 = vpop.eup %1492  ;;  %1162 = vst [vmem:[%s2366_s3 + $0x30] sm:$0xff] %v1144_v49  ;;  %1163 = vst [vmem:[%s2366_s3 + $0x38] sm:$0xff] %v1145_v55 }
 0x38c   : > { %v1146_v26 = vmul.f32 %v1493_v63, %v2274_v44  ;;  %v1147_v46 = vmul.f32 %v1493_v63, %v2277_v14  ;;  %v1128_v58 = vpop.xlane.xlu0 %1127 }
 0x38d   : > { %v1125_v19 = vpop.xlane.xlu1 %1124  ;;  %1498 = vrsqrt.f32 %v1128_v58 }
 0x38e   : > { %1164 = vst [vmem:[%s2366_s3 + $0x40] sm:$0xff] %v1146_v26  ;;  %1165 = vst [vmem:[%s2366_s3 + $0x48] sm:$0xff] %v1147_v46  ;;  %1500 = vrsqrt.f32 %v1125_v19 }
 0x390   : > { %v1495_v32 = vpop.eup %1494 }
 0x391   : > { %v1148_v48 = vmul.f32 %v1495_v32, %v2294_v11  ;;  %v1149_v18 = vmul.f32 %v1495_v32, %v2297_v13 }
 0x393   : > { %v1497_v21 = vpop.eup %1496  ;;  %1166 = vst [vmem:[%s2366_s3 + $0x50] sm:$0xff] %v1148_v48  ;;  %1167 = vst [vmem:[%s2366_s3 + $0x58] sm:$0xff] %v1149_v18 }
 0x394   : > { %v1150_v44 = vmul.f32 %v1497_v21, %v2310_v20  ;;  %v1151_v14 = vmul.f32 %v1497_v21, %v2313_v40 }
 0x396   : > { %1168 = vst [vmem:[%s2366_s3 + $0x60] sm:$0xff] %v1150_v44  ;;  %1169 = vst [vmem:[%s2366_s3 + $0x68] sm:$0xff] %v1151_v14 }
 0x39a   : > { %v1499_v56 = vpop.eup %1498  ;;  %1186 = sbr.rel (!%p2532_p10) target bundleno = 954 (0x3ba), region = 64 }
 0x39b   : > { %v1501_v24 = vpop.eup %1500  ;;  %v1154_v11 = vmul.f32 %v1499_v56, %v2336_v62  ;;  %v1155_v41 = vmul.f32 %v1499_v56, %v2339_v47 }
 0x39c   : > { %v1152_v13 = vmul.f32 %v1501_v24, %v2342_v9  ;;  %v1153_v25 = vmul.f32 %v1501_v24, %v2345_v53 }
 0x39d   : > { %1172 = vst [vmem:[%s2366_s3 + $0x80] sm:$0xff] %v1154_v11  ;;  %1173 = vst [vmem:[%s2366_s3 + $0x88] sm:$0xff] %v1155_v41 }
 0x39e   : > { %1170 = vst [vmem:[%s2366_s3 + $0x70] sm:$0xff] %v1152_v13  ;;  %1171 = vst [vmem:[%s2366_s3 + $0x78] sm:$0xff] %v1153_v25 }
 0x39f   : > { %s2542_s15 = smov (!%p1189_p1, %s1188_s15), 9 }
 0x3a0   : > { %s2407_s1 = sshll.u32 %s2542_s15, 8 }
 0x3a1   : > { %s1194_s16 = ssub.s32 2304, %s2407_s1 }
 0x3a2   : > { %1195 = vsyncadd %s1175_s21, %s1194_s16  ;;  %p1366_p3 = scmp.ne.s32.totalorder %s2407_s1, 0  ;;  %s1390_s19 = smul.u32 2304, %s1759_s9 }
 0x3a3   : > { %s1201_s22 = sshll.u32 %s2193_s13, 4  ;;  %s1687_s10 = smov [#allocation8]   ;;  %s2420_s22 = int_to_ptr.vmem [resolvable:$true] %s1201_s22 }
 0x3a4   : > { %s2418_s25 = scalar_lea.hbm %s2515_s7, %s1390_s19  ;;  %s1580_s12 = scalar_lea.vmem %s2420_s22, %s2407_s1 }
 0x3a5   : > { %p1581_p7 = scmp.ne.s32.totalorder %s2420_s22, %s1580_s12  ;;  %s1584_s15 = sshll.u32 %s1687_s10, 4  ;;  %s1585_s15 = int_to_ptr.vmem [resolvable:$false] %s1584_s15 }
 0x3a6   : > { %s1586_s16 = scalar_lea.vmem %s1585_s15, 4608  ;;  %p1587_p4 = scmp.lt.s32.totalorder %s2420_s22, %s1585_s15 }
 0x3a7   : > { %p1582_p9 = pnand %p1581_p7, %p1366_p3  ;;  %p1588_p6 = scmp.lt.s32.totalorder %s1586_s16, %s1580_s12 }
 0x3a9   : > { %p1583_p12 = pneg %p1582_p9  ;;  %p1589_p11 = por %p1588_p6, %p1587_p4 }
 0x3ab   : > { %p1590_p0 = pnand %p1589_p11, %p1583_p12 }
 0x3ad   : > { %1593 = shalt.err (!%p1590_p0)
}
 0x3ae   : > { %s1594_s13 = scalar_lea.hbm %s2418_s25, %s2407_s1  ;;  %s1598_s23 = scalar_lea.hbm %s2515_s7, 4352 }
 0x3af   : > { %p1595_p2 = scmp.ne.s32.totalorder %s2418_s25, %s1594_s13  ;;  %p1599_p10 = scmp.lt.s32.totalorder %s2418_s25, %s2515_s7 }
 0x3b0   : > { %p1600_p1 = scmp.lt.s32.totalorder %s1598_s23, %s1594_s13 }
 0x3b1   : > { %p1596_p5 = pnand %p1595_p2, %p1366_p3 }
 0x3b2   : > { %p1601_p7 = por %p1600_p1, %p1599_p10 }
 0x3b3   : > { %p1597_p13 = pneg %p1596_p5 }
 0x3b5   : > { %p1602_p9 = pnand %p1601_p7, %p1597_p13 }
 0x3b7   : > { %1605 = shalt.err (!%p1602_p9)
}
 0x3b8   : > { %s1688_s12 = smov 256   ;;  %s1689_s16 = smov 16  }
 0x3b9   : > { %1207 = dma.vmem_to_hbm [thread:$0]  (%p1366_p3), %s2420_s22, %s2407_s1, %s2418_s25, %s1175_s21, %s1688_s12, %s1688_s12, %s1689_s16  }
 0x3ba PF: > { %p2533_p12 = scmp.ne.s32.totalorder %s2523_s17, 0 }
 0x3bb   : > { %s1211_s13 = smul.u32 (%p2533_p12), 9, %s1759_s9 }
 0x3bc   : > { %1210 = sbr.rel (!%p2533_p12) target bundleno = 988 (0x3dc), region = 68 }
 0x3bd   : > { %s1212_s19 = ssub.s32 (%p2533_p12), 17, %s1211_s13 }
 0x3be   : > { %p1213_p4 = scmp.lt.s32.totalorder (%p2533_p12), %s1212_s19, 9 }
 0x3c1   : > { %s2544_s19 = smov (!%p1213_p4, %s1212_s19), 9 }
 0x3c2   : > { %s2450_s26 = sshll.u32 %s2544_s19, 8 }
 0x3c3   : > { %s1218_s23 = ssub.s32 2304, %s2450_s26 }
 0x3c4   : > { %1219 = vsyncadd %s1180_s24, %s1218_s23  ;;  %p1373_p3 = scmp.ne.s32.totalorder %s2450_s26, 0  ;;  %s1391_s17 = smul.u32 2304, %s1759_s9 }
 0x3c5   : > { %s1225_s21 = sshll.u32 %s2366_s3, 4  ;;  %s1690_s15 = smov [#allocation9]   ;;  %s2463_s21 = int_to_ptr.vmem [resolvable:$true] %s1225_s21 }
 0x3c6   : > { %s2461_s25 = scalar_lea.hbm %s2516_s8, %s1391_s17  ;;  %s1606_s10 = scalar_lea.vmem %s2463_s21, %s2450_s26 }
 0x3c7   : > { %p1607_p6 = scmp.ne.s32.totalorder %s2463_s21, %s1606_s10  ;;  %s1610_s12 = sshll.u32 %s1690_s15, 4  ;;  %s1611_s12 = int_to_ptr.vmem [resolvable:$false] %s1610_s12 }
 0x3c8   : > { %s1612_s9 = scalar_lea.vmem %s1611_s12, 4608  ;;  %p1613_p2 = scmp.lt.s32.totalorder %s2463_s21, %s1611_s12 }
 0x3c9   : > { %p1608_p11 = pnand %p1607_p6, %p1373_p3  ;;  %p1614_p5 = scmp.lt.s32.totalorder %s1612_s9, %s1606_s10 }
 0x3cb   : > { %p1609_p0 = pneg %p1608_p11  ;;  %p1615_p13 = por %p1614_p5, %p1613_p2 }
 0x3cd   : > { %p1616_p10 = pnand %p1615_p13, %p1609_p0 }
 0x3cf   : > { %1619 = shalt.err (!%p1616_p10)
}
 0x3d0   : > { %s1620_s3 = scalar_lea.hbm %s2461_s25, %s2450_s26  ;;  %s1624_s19 = scalar_lea.hbm %s2516_s8, 4352 }
 0x3d1   : > { %p1621_p1 = scmp.ne.s32.totalorder %s2461_s25, %s1620_s3  ;;  %p1625_p12 = scmp.lt.s32.totalorder %s2461_s25, %s2516_s8 }
 0x3d2   : > { %p1626_p4 = scmp.lt.s32.totalorder %s1624_s19, %s1620_s3 }
 0x3d3   : > { %p1622_p7 = pnand %p1621_p1, %p1373_p3 }
 0x3d4   : > { %p1627_p6 = por %p1626_p4, %p1625_p12 }
 0x3d5   : > { %p1623_p9 = pneg %p1622_p7 }
 0x3d7   : > { %p1628_p11 = pnand %p1627_p6, %p1623_p9 }
 0x3d9   : > { %1631 = shalt.err (!%p1628_p11)
}
 0x3da   : > { %s1691_s1 = smov 256   ;;  %s1692_s22 = smov 16  }
 0x3db   : > { %1231 = dma.vmem_to_hbm [thread:$0]  (%p1373_p3), %s2463_s21, %s2450_s26, %s2461_s25, %s1180_s24, %s1691_s1, %s1691_s1, %s1692_s22  }
 0x3dc PF: > { %s1240_s10 = sand.u32 1, %s1666_s27   ;;  %p2534_p0 = scmp.ne.s32.totalorder %s2524_s18, 0 }
 0x3dd   : > { %s1241_s15 = scalar_lea.sflag [#allocation4], %s1240_s10 }
 0x3de   : > { %p1413_p2 = pnand %p1353_p8, %p2534_p0 }
 0x3e0   : > { %p1414_p5 = pneg %p1413_p2 }
 0x3e2   : > { %1657 = dma.done.wait (%p1414_p5), %s1241_s15, 2304  }
 0x3e3   : > { %1659 = vsyncadd (%p1414_p5), %s1241_s15, 4294964992  ;;  %s1250_s12 = scalar_lea.sflag [#allocation10], %s1240_s10 }
 0x3e4   : > { %1661 = dma.done.wait (%p1414_p5), %s1250_s12, 2304  }
 0x3e5   : > { %1663 = vsyncadd (%p1414_p5), %s1250_s12, 4294964992  ;;  %p26_p3 = scmp.ge.s32.totalorder %s1763_s11, 4   ;;  %s2535_s27 = smov %s1670_s28 }
 0x3e6   : > { %s2536_s28 = smov %s1674_s29  ;;  %s2537_s29 = smov %s1775_s14 }
 0x3e7   : > { %s2538_s30 = smov %s1763_s11  ;;  %28 = sbr.rel (!%p26_p3) target bundleno = 11 (0xb), region = 118 }
 0x3ec   :  { %1255 = vsyncpa [#allocation3], 1 }
 0x3ed   :  { %1257 = vsyncpa [#allocation3 + $0x1], 1 }
 0x3ee   :  { %1258 = vsyncpa [#allocation6], 1 }
 0x3ef   :  { %1259 = vsyncpa [#allocation4], 1 }
 0x3f0   :  { %1261 = vsyncpa [#allocation4 + $0x1], 1 }
 0x3f1   :  { %1262 = vsyncpa [#allocation10], 1 }
 0x3f2   :  { %1264 = vsyncpa [#allocation10 + $0x1], 1 }

</bundles_post_ra>
